<compile_context>
chip_gen: v7x
topology: tpu7x:2x2x1
jax: 0.10.0
libtpu: 0.0.40
codegen_flags: <defaults>
</compile_context>

<pallas_src>
import functools

import jax
import jax.numpy as jnp
from jax import lax
from jax.experimental import pallas as pl
from jax.experimental.pallas import tpu as pltpu


def _bilstm_kernel(x_ref, w_ref, b_ref, out_ref, *, seq_len, hidden_size,
                   unroll_limit=64):
    """x_ref: (T,B,I) f32, w_ref: (2(I+H),8H) bf16 block-diag, b_ref: (1,8H) f32,
    out_ref: (T,B,4H) f32 slab [h_f|c_f|h_b|c_b] (bwd entries are for time T-1-t)."""
    T = seq_len
    H = hidden_size
    B = x_ref.shape[1]

    # Load packed parameters once; they stay resident for the whole recurrence.
    w = w_ref[...]                       # (2*(I+H), 8H) bf16
    b = b_ref[...]                       # (1, 8H) f32

    def body(t, carry):
        h_f, c_f, h_b, c_b = carry
        x_f = x_ref[t]                   # forward walks t = 0..T-1
        x_b = x_ref[T - 1 - t]           # backward walks T-1..0
        # One fused MXU matmul for BOTH directions (block-diagonal weights).
        lhs = jnp.concatenate([x_f, h_f, x_b, h_b],
                              axis=-1).astype(jnp.bfloat16)        # (B, 2(I+H))
        gates = jnp.dot(lhs, w, preferred_element_type=jnp.float32) + b  # (B, 8H)
        # Full-slab transcendentals, then slice (PyTorch gate order i, f, g, o).
        sig = jax.nn.sigmoid(gates)
        th = jnp.tanh(gates)
        i_f, f_f, o_f = sig[:, 0 * H:1 * H], sig[:, 1 * H:2 * H], sig[:, 3 * H:4 * H]
        g_f = th[:, 2 * H:3 * H]
        i_b, f_b, o_b = sig[:, 4 * H:5 * H], sig[:, 5 * H:6 * H], sig[:, 7 * H:8 * H]
        g_b = th[:, 6 * H:7 * H]
        c_f = f_f * c_f + i_f * g_f
        h_f = o_f * jnp.tanh(c_f)
        c_b = f_b * c_b + i_b * g_b
        h_b = o_b * jnp.tanh(c_b)
        # Lane-dense (B, 4H) = (8, 128) slab: one unmasked full-vreg store.
        out_ref[t] = jnp.concatenate([h_f, c_f, h_b, c_b], axis=-1)
        return h_f, c_f, h_b, c_b

    z = jnp.zeros((B, H), jnp.float32)
    carry = (z, z, z, z)
    if T <= unroll_limit:
        # Fully static/unrolled time loop: LLO scheduler sees everything,
        # all indices are compile-time constants.
        for t in range(T):
            carry = body(t, carry)
    else:
        lax.fori_loop(0, T, body, carry)


def bilstm_forward(inp, w_ih_f, w_hh_f, b_ih_f, b_hh_f,
                   w_ih_b, w_hh_b, b_ih_b, b_hh_b):
    """Pallas bidirectional LSTM. Returns (outputs, (h_n, c_n)) like nn.LSTM."""
    T, B, I = inp.shape
    H = w_hh_f.shape[1]
    IH = I + H

    # --- hoisted, once-per-call parameter packing (not per timestep) ---------
    # Per-direction fused weights [Wih; Whh] -> (I+H, 4H), then a block-diagonal
    # stack so both directions share a single MXU matmul per step.
    w_f = jnp.concatenate([w_ih_f.T, w_hh_f.T], axis=0)          # (IH, 4H) f32
    w_b = jnp.concatenate([w_ih_b.T, w_hh_b.T], axis=0)
    zblk = jnp.zeros((IH, 4 * H), jnp.float32)
    w_bd = jnp.concatenate(
        [jnp.concatenate([w_f, zblk], axis=1),
         jnp.concatenate([zblk, w_b], axis=1)],
        axis=0).astype(jnp.bfloat16)                              # (2*IH, 8H) bf16
    bias = jnp.concatenate([b_ih_f + b_hh_f, b_ih_b + b_hh_b]
                           ).reshape(1, 8 * H).astype(jnp.float32)  # (1, 8H)

    kernel = functools.partial(_bilstm_kernel, seq_len=T, hidden_size=H)

    cost = pl.CostEstimate(
        flops=2 * T * B * (2 * IH) * (8 * H),          # one fused matmul / step
        transcendentals=T * B * (16 * H + 2 * H),      # sigmoid+tanh slabs + cell tanh
        bytes_accessed=(T * B * I * 4                  # input (read once)
                        + 2 * IH * 8 * H * 2           # bf16 block-diag weights
                        + 8 * H * 4                    # biases
                        + T * B * 4 * H * 4))          # output slab

    # No grid / no BlockSpecs: whole arrays are VMEM-resident for the single
    # kernel invocation (everything here is a few tens of KiB).
    slab = pl.pallas_call(
        kernel,
        out_shape=jax.ShapeDtypeStruct((T, B, 4 * H), jnp.float32),
        compiler_params=pltpu.CompilerParams(vmem_limit_bytes=64 * 1024 * 1024),
        cost_estimate=cost,
    )(inp, w_bd, bias)

    # Unpack the lane-dense slab into nn.LSTM's output convention.
    h_fwd = slab[:, :, 0 * H:1 * H]                       # fwd h at time t
    c_fwd = slab[:, :, 1 * H:2 * H]
    h_bwd_rev = slab[:, :, 2 * H:3 * H]                   # bwd h at time T-1-t
    c_bwd_rev = slab[:, :, 3 * H:4 * H]
    outputs = jnp.concatenate([h_fwd, jnp.flip(h_bwd_rev, axis=0)], axis=-1)  # (T,B,2H)
    h_n = jnp.stack([h_fwd[T - 1], h_bwd_rev[T - 1]], axis=0)                 # (2,B,H)
    c_n = jnp.stack([c_fwd[T - 1], c_bwd_rev[T - 1]], axis=0)                 # (2,B,H)
    return outputs, (h_n, c_n)


def _reference_bilstm(inp, w_ih_f, w_hh_f, b_ih_f, b_hh_f,
                      w_ih_b, w_hh_b, b_ih_b, b_hh_b, *, mxu_dtype=jnp.float32):
    """Pure-JAX reference mirroring torch.nn.LSTM (bidirectional, zero init).

    mxu_dtype=jnp.bfloat16 reproduces the kernel's MXU precision policy
    (bf16 operands, f32 accumulation); mxu_dtype=jnp.float32 is the exact
    PyTorch-equivalent math."""
    T, B, I = inp.shape
    H = w_hh_f.shape[1]

    def run(xs, w_ih, w_hh, b_ih, b_hh):
        wi = w_ih.T.astype(mxu_dtype)
        wh = w_hh.T.astype(mxu_dtype)

        def cell(carry, x):
            h, c = carry
            gates = (jnp.dot(x.astype(mxu_dtype), wi, preferred_element_type=jnp.float32)
                     + jnp.dot(h.astype(mxu_dtype), wh, preferred_element_type=jnp.float32)
                     + b_ih + b_hh)
            i_g = jax.nn.sigmoid(gates[:, 0 * H:1 * H])
            f_g = jax.nn.sigmoid(gates[:, 1 * H:2 * H])
            g_g = jnp.tanh(gates[:, 2 * H:3 * H])
            o_g = jax.nn.sigmoid(gates[:, 3 * H:4 * H])
            c_new = f_g * c + i_g * g_g
            h_new = o_g * jnp.tanh(c_new)
            return (h_new, c_new), h_new

        init = (jnp.zeros((B, H), jnp.float32), jnp.zeros((B, H), jnp.float32))
        (h_last, c_last), hs = jax.lax.scan(cell, init, xs)
        return hs, h_last, c_last

    hs_f, hn_f, cn_f = run(inp, w_ih_f, w_hh_f, b_ih_f, b_hh_f)
    hs_b_rev, hn_b, cn_b = run(inp[::-1], w_ih_b, w_hh_b, b_ih_b, b_hh_b)
    outputs = jnp.concatenate([hs_f, hs_b_rev[::-1]], axis=-1)
    return outputs, (jnp.stack([hn_f, hn_b]), jnp.stack([cn_f, cn_b]))


if __name__ == "__main__":
    T, B, INPUT_SIZE, HIDDEN_SIZE = 8, 8, 16, 32

    key = jax.random.PRNGKey(0)
    keys = jax.random.split(key, 9)
    inp = jax.random.normal(keys[0], (T, B, INPUT_SIZE), dtype=jnp.float32)

    # PyTorch nn.LSTM default init: U(-1/sqrt(H), 1/sqrt(H)) for all params.
    bound = 1.0 / (HIDDEN_SIZE ** 0.5)

    def u(k, shape):
        return jax.random.uniform(k, shape, minval=-bound, maxval=bound,
                                  dtype=jnp.float32)

    w_ih_f = u(keys[1], (4 * HIDDEN_SIZE, INPUT_SIZE))    # weight_ih_l0
    w_hh_f = u(keys[2], (4 * HIDDEN_SIZE, HIDDEN_SIZE))   # weight_hh_l0
    b_ih_f = u(keys[3], (4 * HIDDEN_SIZE,))
    b_hh_f = u(keys[4], (4 * HIDDEN_SIZE,))
    w_ih_b = u(keys[5], (4 * HIDDEN_SIZE, INPUT_SIZE))    # weight_ih_l0_reverse
    w_hh_b = u(keys[6], (4 * HIDDEN_SIZE, HIDDEN_SIZE))
    b_ih_b = u(keys[7], (4 * HIDDEN_SIZE,))
    b_hh_b = u(keys[8], (4 * HIDDEN_SIZE,))

    fwd = jax.jit(bilstm_forward)
    outputs, (h_n, c_n) = fwd(inp, w_ih_f, w_hh_f, b_ih_f, b_hh_f,
                              w_ih_b, w_hh_b, b_ih_b, b_hh_b)
    jax.block_until_ready((outputs, h_n, c_n))

    # Check vs reference using the same bf16-MXU precision policy (tight).
    out_r, (hn_r, cn_r) = _reference_bilstm(
        inp, w_ih_f, w_hh_f, b_ih_f, b_hh_f,
        w_ih_b, w_hh_b, b_ih_b, b_hh_b, mxu_dtype=jnp.bfloat16)
    assert jnp.allclose(outputs, out_r, atol=1e-2, rtol=1e-2)
    assert jnp.allclose(h_n, hn_r, atol=1e-2, rtol=1e-2)
    assert jnp.allclose(c_n, cn_r, atol=1e-2, rtol=1e-2)

    # Check vs the exact f32 PyTorch math (loose tolerance covers bf16 MXU).
    out_f32, (hn_f32, cn_f32) = _reference_bilstm(
        inp, w_ih_f, w_hh_f, b_ih_f, b_hh_f,
        w_ih_b, w_hh_b, b_ih_b, b_hh_b, mxu_dtype=jnp.float32)
    assert jnp.allclose(outputs, out_f32, atol=1e-1, rtol=1e-1)
    assert jnp.allclose(c_n, cn_f32, atol=1e-1, rtol=1e-1)

    print("KERNEL_OK")
</pallas_src>

<mosaic_0001>
module attributes {stable_mosaic.version = 11 : i64} {
  func.func @_bilstm_kernel(%arg0: memref<8x8x16xf32, #tpu.memory_space<vmem>>, %arg1: memref<96x256xbf16, #tpu.memory_space<vmem>>, %arg2: memref<1x256xf32, #tpu.memory_space<vmem>>, %arg3: memref<8x8x128xf32, #tpu.memory_space<vmem>>) attributes {dimension_semantics = [], scalar_prefetch = 0 : i64, scratch_operands = 0 : i64, tpu.core_type = #tpu.core_type<tc>} {
    %c0 = arith.constant 0 : index
    %c0_0 = arith.constant 0 : index
    %0 = vector.load %arg1[%c0, %c0_0] : memref<96x256xbf16, #tpu.memory_space<vmem>>, vector<96x256xbf16>
    %c0_1 = arith.constant 0 : index
    %c0_2 = arith.constant 0 : index
    %1 = vector.load %arg2[%c0_1, %c0_2] : memref<1x256xf32, #tpu.memory_space<vmem>>, vector<1x256xf32>
    %cst = arith.constant 0.000000e+00 : f32
    %2 = vector.broadcast %cst : f32 to vector<8x32xf32>
    %c0_3 = arith.constant 0 : index
    %c0_4 = arith.constant 0 : index
    %c0_5 = arith.constant 0 : index
    %3 = vector.load %arg0[%c0_3, %c0_4, %c0_5] : memref<8x8x16xf32, #tpu.memory_space<vmem>>, vector<1x8x16xf32>
    %4 = vector.shape_cast %3 : vector<1x8x16xf32> to vector<8x16xf32>
    %c7 = arith.constant 7 : index
    %c0_6 = arith.constant 0 : index
    %c0_7 = arith.constant 0 : index
    %5 = vector.load %arg0[%c7, %c0_6, %c0_7] : memref<8x8x16xf32, #tpu.memory_space<vmem>>, vector<1x8x16xf32>
    %6 = vector.shape_cast %5 : vector<1x8x16xf32> to vector<8x16xf32>
    %7 = tpu.concatenate %4, %2, %6, %2 in 1 : vector<8x16xf32>, vector<8x32xf32>, vector<8x16xf32>, vector<8x32xf32> -> vector<8x96xf32>
    %8 = arith.truncf %7 : vector<8x96xf32> to vector<8x96xbf16>
    %cst_8 = arith.constant dense<0.000000e+00> : vector<8x256xf32>
    %9 = tpu.matmul %8, %0, %cst_8 {dimension_numbers = #tpu.dot_dimension_numbers<[1], [0], [0], [1], [0, 0, 1, 1], [], []>} : vector<8x96xbf16>, vector<96x256xbf16>, vector<8x256xf32> -> vector<8x256xf32>
    %10 = vector.broadcast %1 : vector<1x256xf32> to vector<8x256xf32>
    %11 = arith.addf %9, %10 : vector<8x256xf32>
    %12 = arith.negf %11 : vector<8x256xf32>
    %13 = math.exp %12 : vector<8x256xf32>
    %cst_9 = arith.constant 1.000000e+00 : f32
    %14 = vector.broadcast %cst_9 : f32 to vector<8x256xf32>
    %15 = arith.addf %14, %13 : vector<8x256xf32>
    %16 = arith.divf %14, %15 : vector<8x256xf32>
    %17 = math.tanh %11 : vector<8x256xf32>
    %18 = vector.extract_strided_slice %16 {offsets = [0, 0], sizes = [8, 32], strides = [1, 1]} : vector<8x256xf32> to vector<8x32xf32>
    %19 = vector.extract_strided_slice %16 {offsets = [0, 32], sizes = [8, 32], strides = [1, 1]} : vector<8x256xf32> to vector<8x32xf32>
    %20 = vector.extract_strided_slice %16 {offsets = [0, 96], sizes = [8, 32], strides = [1, 1]} : vector<8x256xf32> to vector<8x32xf32>
    %21 = vector.extract_strided_slice %17 {offsets = [0, 64], sizes = [8, 32], strides = [1, 1]} : vector<8x256xf32> to vector<8x32xf32>
    %22 = vector.extract_strided_slice %16 {offsets = [0, 128], sizes = [8, 32], strides = [1, 1]} : vector<8x256xf32> to vector<8x32xf32>
    %23 = vector.extract_strided_slice %16 {offsets = [0, 160], sizes = [8, 32], strides = [1, 1]} : vector<8x256xf32> to vector<8x32xf32>
    %24 = vector.extract_strided_slice %16 {offsets = [0, 224], sizes = [8, 32], strides = [1, 1]} : vector<8x256xf32> to vector<8x32xf32>
    %25 = vector.extract_strided_slice %17 {offsets = [0, 192], sizes = [8, 32], strides = [1, 1]} : vector<8x256xf32> to vector<8x32xf32>
    %26 = arith.mulf %19, %2 : vector<8x32xf32>
    %27 = arith.mulf %18, %21 : vector<8x32xf32>
    %28 = arith.addf %26, %27 : vector<8x32xf32>
    %29 = math.tanh %28 : vector<8x32xf32>
    %30 = arith.mulf %20, %29 : vector<8x32xf32>
    %31 = arith.mulf %23, %2 : vector<8x32xf32>
    %32 = arith.mulf %22, %25 : vector<8x32xf32>
    %33 = arith.addf %31, %32 : vector<8x32xf32>
    %34 = math.tanh %33 : vector<8x32xf32>
    %35 = arith.mulf %24, %34 : vector<8x32xf32>
    %36 = tpu.concatenate %30, %28, %35, %33 in 1 : vector<8x32xf32>, vector<8x32xf32>, vector<8x32xf32>, vector<8x32xf32> -> vector<8x128xf32>
    %c0_10 = arith.constant 0 : index
    %c0_11 = arith.constant 0 : index
    %c0_12 = arith.constant 0 : index
    %37 = vector.load %arg3[%c0_10, %c0_11, %c0_12] : memref<8x8x128xf32, #tpu.memory_space<vmem>>, vector<1x8x128xf32>
    %38 = vector.shape_cast %37 : vector<1x8x128xf32> to vector<8x128xf32>
    %39 = vector.shape_cast %36 : vector<8x128xf32> to vector<1x8x128xf32>
    tpu.vector_store %arg3[%c0_10, %c0_11, %c0_12], %39 {strides = array<i32>} : memref<8x8x128xf32, #tpu.memory_space<vmem>>, vector<1x8x128xf32>,
    %c1 = arith.constant 1 : index
    %c0_13 = arith.constant 0 : index
    %c0_14 = arith.constant 0 : index
    %40 = vector.load %arg0[%c1, %c0_13, %c0_14] : memref<8x8x16xf32, #tpu.memory_space<vmem>>, vector<1x8x16xf32>
    %41 = vector.shape_cast %40 : vector<1x8x16xf32> to vector<8x16xf32>
    %c6 = arith.constant 6 : index
    %c0_15 = arith.constant 0 : index
    %c0_16 = arith.constant 0 : index
    %42 = vector.load %arg0[%c6, %c0_15, %c0_16] : memref<8x8x16xf32, #tpu.memory_space<vmem>>, vector<1x8x16xf32>
    %43 = vector.shape_cast %42 : vector<1x8x16xf32> to vector<8x16xf32>
    %44 = tpu.concatenate %41, %30, %43, %35 in 1 : vector<8x16xf32>, vector<8x32xf32>, vector<8x16xf32>, vector<8x32xf32> -> vector<8x96xf32>
    %45 = arith.truncf %44 : vector<8x96xf32> to vector<8x96xbf16>
    %cst_17 = arith.constant dense<0.000000e+00> : vector<8x256xf32>
    %46 = tpu.matmul %45, %0, %cst_17 {dimension_numbers = #tpu.dot_dimension_numbers<[1], [0], [0], [1], [0, 0, 1, 1], [], []>} : vector<8x96xbf16>, vector<96x256xbf16>, vector<8x256xf32> -> vector<8x256xf32>
    %47 = vector.broadcast %1 : vector<1x256xf32> to vector<8x256xf32>
    %48 = arith.addf %46, %47 : vector<8x256xf32>
    %49 = arith.negf %48 : vector<8x256xf32>
    %50 = math.exp %49 : vector<8x256xf32>
    %cst_18 = arith.constant 1.000000e+00 : f32
    %51 = vector.broadcast %cst_18 : f32 to vector<8x256xf32>
    %52 = arith.addf %51, %50 : vector<8x256xf32>
    %53 = arith.divf %51, %52 : vector<8x256xf32>
    %54 = math.tanh %48 : vector<8x256xf32>
    %55 = vector.extract_strided_slice %53 {offsets = [0, 0], sizes = [8, 32], strides = [1, 1]} : vector<8x256xf32> to vector<8x32xf32>
    %56 = vector.extract_strided_slice %53 {offsets = [0, 32], sizes = [8, 32], strides = [1, 1]} : vector<8x256xf32> to vector<8x32xf32>
    %57 = vector.extract_strided_slice %53 {offsets = [0, 96], sizes = [8, 32], strides = [1, 1]} : vector<8x256xf32> to vector<8x32xf32>
    %58 = vector.extract_strided_slice %54 {offsets = [0, 64], sizes = [8, 32], strides = [1, 1]} : vector<8x256xf32> to vector<8x32xf32>
    %59 = vector.extract_strided_slice %53 {offsets = [0, 128], sizes = [8, 32], strides = [1, 1]} : vector<8x256xf32> to vector<8x32xf32>
    %60 = vector.extract_strided_slice %53 {offsets = [0, 160], sizes = [8, 32], strides = [1, 1]} : vector<8x256xf32> to vector<8x32xf32>
    %61 = vector.extract_strided_slice %53 {offsets = [0, 224], sizes = [8, 32], strides = [1, 1]} : vector<8x256xf32> to vector<8x32xf32>
    %62 = vector.extract_strided_slice %54 {offsets = [0, 192], sizes = [8, 32], strides = [1, 1]} : vector<8x256xf32> to vector<8x32xf32>
    %63 = arith.mulf %56, %28 : vector<8x32xf32>
    %64 = arith.mulf %55, %58 : vector<8x32xf32>
    %65 = arith.addf %63, %64 : vector<8x32xf32>
    %66 = math.tanh %65 : vector<8x32xf32>
    %67 = arith.mulf %57, %66 : vector<8x32xf32>
    %68 = arith.mulf %60, %33 : vector<8x32xf32>
    %69 = arith.mulf %59, %62 : vector<8x32xf32>
    %70 = arith.addf %68, %69 : vector<8x32xf32>
    %71 = math.tanh %70 : vector<8x32xf32>
    %72 = arith.mulf %61, %71 : vector<8x32xf32>
    %73 = tpu.concatenate %67, %65, %72, %70 in 1 : vector<8x32xf32>, vector<8x32xf32>, vector<8x32xf32>, vector<8x32xf32> -> vector<8x128xf32>
    %c1_19 = arith.constant 1 : index
    %c0_20 = arith.constant 0 : index
    %c0_21 = arith.constant 0 : index
    %74 = vector.load %arg3[%c1_19, %c0_20, %c0_21] : memref<8x8x128xf32, #tpu.memory_space<vmem>>, vector<1x8x128xf32>
    %75 = vector.shape_cast %74 : vector<1x8x128xf32> to vector<8x128xf32>
    %76 = vector.shape_cast %73 : vector<8x128xf32> to vector<1x8x128xf32>
    tpu.vector_store %arg3[%c1_19, %c0_20, %c0_21], %76 {strides = array<i32>} : memref<8x8x128xf32, #tpu.memory_space<vmem>>, vector<1x8x128xf32>,
    %c2 = arith.constant 2 : index
    %c0_22 = arith.constant 0 : index
    %c0_23 = arith.constant 0 : index
    %77 = vector.load %arg0[%c2, %c0_22, %c0_23] : memref<8x8x16xf32, #tpu.memory_space<vmem>>, vector<1x8x16xf32>
    %78 = vector.shape_cast %77 : vector<1x8x16xf32> to vector<8x16xf32>
    %c5 = arith.constant 5 : index
    %c0_24 = arith.constant 0 : index
    %c0_25 = arith.constant 0 : index
    %79 = vector.load %arg0[%c5, %c0_24, %c0_25] : memref<8x8x16xf32, #tpu.memory_space<vmem>>, vector<1x8x16xf32>
    %80 = vector.shape_cast %79 : vector<1x8x16xf32> to vector<8x16xf32>
    %81 = tpu.concatenate %78, %67, %80, %72 in 1 : vector<8x16xf32>, vector<8x32xf32>, vector<8x16xf32>, vector<8x32xf32> -> vector<8x96xf32>
    %82 = arith.truncf %81 : vector<8x96xf32> to vector<8x96xbf16>
    %cst_26 = arith.constant dense<0.000000e+00> : vector<8x256xf32>
    %83 = tpu.matmul %82, %0, %cst_26 {dimension_numbers = #tpu.dot_dimension_numbers<[1], [0], [0], [1], [0, 0, 1, 1], [], []>} : vector<8x96xbf16>, vector<96x256xbf16>, vector<8x256xf32> -> vector<8x256xf32>
    %84 = vector.broadcast %1 : vector<1x256xf32> to vector<8x256xf32>
    %85 = arith.addf %83, %84 : vector<8x256xf32>
    %86 = arith.negf %85 : vector<8x256xf32>
    %87 = math.exp %86 : vector<8x256xf32>
    %cst_27 = arith.constant 1.000000e+00 : f32
    %88 = vector.broadcast %cst_27 : f32 to vector<8x256xf32>
    %89 = arith.addf %88, %87 : vector<8x256xf32>
    %90 = arith.divf %88, %89 : vector<8x256xf32>
    %91 = math.tanh %85 : vector<8x256xf32>
    %92 = vector.extract_strided_slice %90 {offsets = [0, 0], sizes = [8, 32], strides = [1, 1]} : vector<8x256xf32> to vector<8x32xf32>
    %93 = vector.extract_strided_slice %90 {offsets = [0, 32], sizes = [8, 32], strides = [1, 1]} : vector<8x256xf32> to vector<8x32xf32>
    %94 = vector.extract_strided_slice %90 {offsets = [0, 96], sizes = [8, 32], strides = [1, 1]} : vector<8x256xf32> to vector<8x32xf32>
    %95 = vector.extract_strided_slice %91 {offsets = [0, 64], sizes = [8, 32], strides = [1, 1]} : vector<8x256xf32> to vector<8x32xf32>
    %96 = vector.extract_strided_slice %90 {offsets = [0, 128], sizes = [8, 32], strides = [1, 1]} : vector<8x256xf32> to vector<8x32xf32>
    %97 = vector.extract_strided_slice %90 {offsets = [0, 160], sizes = [8, 32], strides = [1, 1]} : vector<8x256xf32> to vector<8x32xf32>
    %98 = vector.extract_strided_slice %90 {offsets = [0, 224], sizes = [8, 32], strides = [1, 1]} : vector<8x256xf32> to vector<8x32xf32>
    %99 = vector.extract_strided_slice %91 {offsets = [0, 192], sizes = [8, 32], strides = [1, 1]} : vector<8x256xf32> to vector<8x32xf32>
    %100 = arith.mulf %93, %65 : vector<8x32xf32>
    %101 = arith.mulf %92, %95 : vector<8x32xf32>
    %102 = arith.addf %100, %101 : vector<8x32xf32>
    %103 = math.tanh %102 : vector<8x32xf32>
    %104 = arith.mulf %94, %103 : vector<8x32xf32>
    %105 = arith.mulf %97, %70 : vector<8x32xf32>
    %106 = arith.mulf %96, %99 : vector<8x32xf32>
    %107 = arith.addf %105, %106 : vector<8x32xf32>
    %108 = math.tanh %107 : vector<8x32xf32>
    %109 = arith.mulf %98, %108 : vector<8x32xf32>
    %110 = tpu.concatenate %104, %102, %109, %107 in 1 : vector<8x32xf32>, vector<8x32xf32>, vector<8x32xf32>, vector<8x32xf32> -> vector<8x128xf32>
    %c2_28 = arith.constant 2 : index
    %c0_29 = arith.constant 0 : index
    %c0_30 = arith.constant 0 : index
    %111 = vector.load %arg3[%c2_28, %c0_29, %c0_30] : memref<8x8x128xf32, #tpu.memory_space<vmem>>, vector<1x8x128xf32>
    %112 = vector.shape_cast %111 : vector<1x8x128xf32> to vector<8x128xf32>
    %113 = vector.shape_cast %110 : vector<8x128xf32> to vector<1x8x128xf32>
    tpu.vector_store %arg3[%c2_28, %c0_29, %c0_30], %113 {strides = array<i32>} : memref<8x8x128xf32, #tpu.memory_space<vmem>>, vector<1x8x128xf32>,
    %c3 = arith.constant 3 : index
    %c0_31 = arith.constant 0 : index
    %c0_32 = arith.constant 0 : index
    %114 = vector.load %arg0[%c3, %c0_31, %c0_32] : memref<8x8x16xf32, #tpu.memory_space<vmem>>, vector<1x8x16xf32>
    %115 = vector.shape_cast %114 : vector<1x8x16xf32> to vector<8x16xf32>
    %c4 = arith.constant 4 : index
    %c0_33 = arith.constant 0 : index
    %c0_34 = arith.constant 0 : index
    %116 = vector.load %arg0[%c4, %c0_33, %c0_34] : memref<8x8x16xf32, #tpu.memory_space<vmem>>, vector<1x8x16xf32>
    %117 = vector.shape_cast %116 : vector<1x8x16xf32> to vector<8x16xf32>
    %118 = tpu.concatenate %115, %104, %117, %109 in 1 : vector<8x16xf32>, vector<8x32xf32>, vector<8x16xf32>, vector<8x32xf32> -> vector<8x96xf32>
    %119 = arith.truncf %118 : vector<8x96xf32> to vector<8x96xbf16>
    %cst_35 = arith.constant dense<0.000000e+00> : vector<8x256xf32>
    %120 = tpu.matmul %119, %0, %cst_35 {dimension_numbers = #tpu.dot_dimension_numbers<[1], [0], [0], [1], [0, 0, 1, 1], [], []>} : vector<8x96xbf16>, vector<96x256xbf16>, vector<8x256xf32> -> vector<8x256xf32>
    %121 = vector.broadcast %1 : vector<1x256xf32> to vector<8x256xf32>
    %122 = arith.addf %120, %121 : vector<8x256xf32>
    %123 = arith.negf %122 : vector<8x256xf32>
    %124 = math.exp %123 : vector<8x256xf32>
    %cst_36 = arith.constant 1.000000e+00 : f32
    %125 = vector.broadcast %cst_36 : f32 to vector<8x256xf32>
    %126 = arith.addf %125, %124 : vector<8x256xf32>
    %127 = arith.divf %125, %126 : vector<8x256xf32>
    %128 = math.tanh %122 : vector<8x256xf32>
    %129 = vector.extract_strided_slice %127 {offsets = [0, 0], sizes = [8, 32], strides = [1, 1]} : vector<8x256xf32> to vector<8x32xf32>
    %130 = vector.extract_strided_slice %127 {offsets = [0, 32], sizes = [8, 32], strides = [1, 1]} : vector<8x256xf32> to vector<8x32xf32>
    %131 = vector.extract_strided_slice %127 {offsets = [0, 96], sizes = [8, 32], strides = [1, 1]} : vector<8x256xf32> to vector<8x32xf32>
    %132 = vector.extract_strided_slice %128 {offsets = [0, 64], sizes = [8, 32], strides = [1, 1]} : vector<8x256xf32> to vector<8x32xf32>
    %133 = vector.extract_strided_slice %127 {offsets = [0, 128], sizes = [8, 32], strides = [1, 1]} : vector<8x256xf32> to vector<8x32xf32>
    %134 = vector.extract_strided_slice %127 {offsets = [0, 160], sizes = [8, 32], strides = [1, 1]} : vector<8x256xf32> to vector<8x32xf32>
    %135 = vector.extract_strided_slice %127 {offsets = [0, 224], sizes = [8, 32], strides = [1, 1]} : vector<8x256xf32> to vector<8x32xf32>
    %136 = vector.extract_strided_slice %128 {offsets = [0, 192], sizes = [8, 32], strides = [1, 1]} : vector<8x256xf32> to vector<8x32xf32>
    %137 = arith.mulf %130, %102 : vector<8x32xf32>
    %138 = arith.mulf %129, %132 : vector<8x32xf32>
    %139 = arith.addf %137, %138 : vector<8x32xf32>
    %140 = math.tanh %139 : vector<8x32xf32>
    %141 = arith.mulf %131, %140 : vector<8x32xf32>
    %142 = arith.mulf %134, %107 : vector<8x32xf32>
    %143 = arith.mulf %133, %136 : vector<8x32xf32>
    %144 = arith.addf %142, %143 : vector<8x32xf32>
    %145 = math.tanh %144 : vector<8x32xf32>
    %146 = arith.mulf %135, %145 : vector<8x32xf32>
    %147 = tpu.concatenate %141, %139, %146, %144 in 1 : vector<8x32xf32>, vector<8x32xf32>, vector<8x32xf32>, vector<8x32xf32> -> vector<8x128xf32>
    %c3_37 = arith.constant 3 : index
    %c0_38 = arith.constant 0 : index
    %c0_39 = arith.constant 0 : index
    %148 = vector.load %arg3[%c3_37, %c0_38, %c0_39] : memref<8x8x128xf32, #tpu.memory_space<vmem>>, vector<1x8x128xf32>
    %149 = vector.shape_cast %148 : vector<1x8x128xf32> to vector<8x128xf32>
    %150 = vector.shape_cast %147 : vector<8x128xf32> to vector<1x8x128xf32>
    tpu.vector_store %arg3[%c3_37, %c0_38, %c0_39], %150 {strides = array<i32>} : memref<8x8x128xf32, #tpu.memory_space<vmem>>, vector<1x8x128xf32>,
    %c4_40 = arith.constant 4 : index
    %c0_41 = arith.constant 0 : index
    %c0_42 = arith.constant 0 : index
    %151 = vector.load %arg0[%c4_40, %c0_41, %c0_42] : memref<8x8x16xf32, #tpu.memory_space<vmem>>, vector<1x8x16xf32>
    %152 = vector.shape_cast %151 : vector<1x8x16xf32> to vector<8x16xf32>
    %c3_43 = arith.constant 3 : index
    %c0_44 = arith.constant 0 : index
    %c0_45 = arith.constant 0 : index
    %153 = vector.load %arg0[%c3_43, %c0_44, %c0_45] : memref<8x8x16xf32, #tpu.memory_space<vmem>>, vector<1x8x16xf32>
    %154 = vector.shape_cast %153 : vector<1x8x16xf32> to vector<8x16xf32>
    %155 = tpu.concatenate %152, %141, %154, %146 in 1 : vector<8x16xf32>, vector<8x32xf32>, vector<8x16xf32>, vector<8x32xf32> -> vector<8x96xf32>
    %156 = arith.truncf %155 : vector<8x96xf32> to vector<8x96xbf16>
    %cst_46 = arith.constant dense<0.000000e+00> : vector<8x256xf32>
    %157 = tpu.matmul %156, %0, %cst_46 {dimension_numbers = #tpu.dot_dimension_numbers<[1], [0], [0], [1], [0, 0, 1, 1], [], []>} : vector<8x96xbf16>, vector<96x256xbf16>, vector<8x256xf32> -> vector<8x256xf32>
    %158 = vector.broadcast %1 : vector<1x256xf32> to vector<8x256xf32>
    %159 = arith.addf %157, %158 : vector<8x256xf32>
    %160 = arith.negf %159 : vector<8x256xf32>
    %161 = math.exp %160 : vector<8x256xf32>
    %cst_47 = arith.constant 1.000000e+00 : f32
    %162 = vector.broadcast %cst_47 : f32 to vector<8x256xf32>
    %163 = arith.addf %162, %161 : vector<8x256xf32>
    %164 = arith.divf %162, %163 : vector<8x256xf32>
    %165 = math.tanh %159 : vector<8x256xf32>
    %166 = vector.extract_strided_slice %164 {offsets = [0, 0], sizes = [8, 32], strides = [1, 1]} : vector<8x256xf32> to vector<8x32xf32>
    %167 = vector.extract_strided_slice %164 {offsets = [0, 32], sizes = [8, 32], strides = [1, 1]} : vector<8x256xf32> to vector<8x32xf32>
    %168 = vector.extract_strided_slice %164 {offsets = [0, 96], sizes = [8, 32], strides = [1, 1]} : vector<8x256xf32> to vector<8x32xf32>
    %169 = vector.extract_strided_slice %165 {offsets = [0, 64], sizes = [8, 32], strides = [1, 1]} : vector<8x256xf32> to vector<8x32xf32>
    %170 = vector.extract_strided_slice %164 {offsets = [0, 128], sizes = [8, 32], strides = [1, 1]} : vector<8x256xf32> to vector<8x32xf32>
    %171 = vector.extract_strided_slice %164 {offsets = [0, 160], sizes = [8, 32], strides = [1, 1]} : vector<8x256xf32> to vector<8x32xf32>
    %172 = vector.extract_strided_slice %164 {offsets = [0, 224], sizes = [8, 32], strides = [1, 1]} : vector<8x256xf32> to vector<8x32xf32>
    %173 = vector.extract_strided_slice %165 {offsets = [0, 192], sizes = [8, 32], strides = [1, 1]} : vector<8x256xf32> to vector<8x32xf32>
    %174 = arith.mulf %167, %139 : vector<8x32xf32>
    %175 = arith.mulf %166, %169 : vector<8x32xf32>
    %176 = arith.addf %174, %175 : vector<8x32xf32>
    %177 = math.tanh %176 : vector<8x32xf32>
    %178 = arith.mulf %168, %177 : vector<8x32xf32>
    %179 = arith.mulf %171, %144 : vector<8x32xf32>
    %180 = arith.mulf %170, %173 : vector<8x32xf32>
    %181 = arith.addf %179, %180 : vector<8x32xf32>
    %182 = math.tanh %181 : vector<8x32xf32>
    %183 = arith.mulf %172, %182 : vector<8x32xf32>
    %184 = tpu.concatenate %178, %176, %183, %181 in 1 : vector<8x32xf32>, vector<8x32xf32>, vector<8x32xf32>, vector<8x32xf32> -> vector<8x128xf32>
    %c4_48 = arith.constant 4 : index
    %c0_49 = arith.constant 0 : index
    %c0_50 = arith.constant 0 : index
    %185 = vector.load %arg3[%c4_48, %c0_49, %c0_50] : memref<8x8x128xf32, #tpu.memory_space<vmem>>, vector<1x8x128xf32>
    %186 = vector.shape_cast %185 : vector<1x8x128xf32> to vector<8x128xf32>
    %187 = vector.shape_cast %184 : vector<8x128xf32> to vector<1x8x128xf32>
    tpu.vector_store %arg3[%c4_48, %c0_49, %c0_50], %187 {strides = array<i32>} : memref<8x8x128xf32, #tpu.memory_space<vmem>>, vector<1x8x128xf32>,
    %c5_51 = arith.constant 5 : index
    %c0_52 = arith.constant 0 : index
    %c0_53 = arith.constant 0 : index
    %188 = vector.load %arg0[%c5_51, %c0_52, %c0_53] : memref<8x8x16xf32, #tpu.memory_space<vmem>>, vector<1x8x16xf32>
    %189 = vector.shape_cast %188 : vector<1x8x16xf32> to vector<8x16xf32>
    %c2_54 = arith.constant 2 : index
    %c0_55 = arith.constant 0 : index
    %c0_56 = arith.constant 0 : index
    %190 = vector.load %arg0[%c2_54, %c0_55, %c0_56] : memref<8x8x16xf32, #tpu.memory_space<vmem>>, vector<1x8x16xf32>
    %191 = vector.shape_cast %190 : vector<1x8x16xf32> to vector<8x16xf32>
    %192 = tpu.concatenate %189, %178, %191, %183 in 1 : vector<8x16xf32>, vector<8x32xf32>, vector<8x16xf32>, vector<8x32xf32> -> vector<8x96xf32>
    %193 = arith.truncf %192 : vector<8x96xf32> to vector<8x96xbf16>
    %cst_57 = arith.constant dense<0.000000e+00> : vector<8x256xf32>
    %194 = tpu.matmul %193, %0, %cst_57 {dimension_numbers = #tpu.dot_dimension_numbers<[1], [0], [0], [1], [0, 0, 1, 1], [], []>} : vector<8x96xbf16>, vector<96x256xbf16>, vector<8x256xf32> -> vector<8x256xf32>
    %195 = vector.broadcast %1 : vector<1x256xf32> to vector<8x256xf32>
    %196 = arith.addf %194, %195 : vector<8x256xf32>
    %197 = arith.negf %196 : vector<8x256xf32>
    %198 = math.exp %197 : vector<8x256xf32>
    %cst_58 = arith.constant 1.000000e+00 : f32
    %199 = vector.broadcast %cst_58 : f32 to vector<8x256xf32>
    %200 = arith.addf %199, %198 : vector<8x256xf32>
    %201 = arith.divf %199, %200 : vector<8x256xf32>
    %202 = math.tanh %196 : vector<8x256xf32>
    %203 = vector.extract_strided_slice %201 {offsets = [0, 0], sizes = [8, 32], strides = [1, 1]} : vector<8x256xf32> to vector<8x32xf32>
    %204 = vector.extract_strided_slice %201 {offsets = [0, 32], sizes = [8, 32], strides = [1, 1]} : vector<8x256xf32> to vector<8x32xf32>
    %205 = vector.extract_strided_slice %201 {offsets = [0, 96], sizes = [8, 32], strides = [1, 1]} : vector<8x256xf32> to vector<8x32xf32>
    %206 = vector.extract_strided_slice %202 {offsets = [0, 64], sizes = [8, 32], strides = [1, 1]} : vector<8x256xf32> to vector<8x32xf32>
    %207 = vector.extract_strided_slice %201 {offsets = [0, 128], sizes = [8, 32], strides = [1, 1]} : vector<8x256xf32> to vector<8x32xf32>
    %208 = vector.extract_strided_slice %201 {offsets = [0, 160], sizes = [8, 32], strides = [1, 1]} : vector<8x256xf32> to vector<8x32xf32>
    %209 = vector.extract_strided_slice %201 {offsets = [0, 224], sizes = [8, 32], strides = [1, 1]} : vector<8x256xf32> to vector<8x32xf32>
    %210 = vector.extract_strided_slice %202 {offsets = [0, 192], sizes = [8, 32], strides = [1, 1]} : vector<8x256xf32> to vector<8x32xf32>
    %211 = arith.mulf %204, %176 : vector<8x32xf32>
    %212 = arith.mulf %203, %206 : vector<8x32xf32>
    %213 = arith.addf %211, %212 : vector<8x32xf32>
    %214 = math.tanh %213 : vector<8x32xf32>
    %215 = arith.mulf %205, %214 : vector<8x32xf32>
    %216 = arith.mulf %208, %181 : vector<8x32xf32>
    %217 = arith.mulf %207, %210 : vector<8x32xf32>
    %218 = arith.addf %216, %217 : vector<8x32xf32>
    %219 = math.tanh %218 : vector<8x32xf32>
    %220 = arith.mulf %209, %219 : vector<8x32xf32>
    %221 = tpu.concatenate %215, %213, %220, %218 in 1 : vector<8x32xf32>, vector<8x32xf32>, vector<8x32xf32>, vector<8x32xf32> -> vector<8x128xf32>
    %c5_59 = arith.constant 5 : index
    %c0_60 = arith.constant 0 : index
    %c0_61 = arith.constant 0 : index
    %222 = vector.load %arg3[%c5_59, %c0_60, %c0_61] : memref<8x8x128xf32, #tpu.memory_space<vmem>>, vector<1x8x128xf32>
    %223 = vector.shape_cast %222 : vector<1x8x128xf32> to vector<8x128xf32>
    %224 = vector.shape_cast %221 : vector<8x128xf32> to vector<1x8x128xf32>
    tpu.vector_store %arg3[%c5_59, %c0_60, %c0_61], %224 {strides = array<i32>} : memref<8x8x128xf32, #tpu.memory_space<vmem>>, vector<1x8x128xf32>,
    %c6_62 = arith.constant 6 : index
    %c0_63 = arith.constant 0 : index
    %c0_64 = arith.constant 0 : index
    %225 = vector.load %arg0[%c6_62, %c0_63, %c0_64] : memref<8x8x16xf32, #tpu.memory_space<vmem>>, vector<1x8x16xf32>
    %226 = vector.shape_cast %225 : vector<1x8x16xf32> to vector<8x16xf32>
    %c1_65 = arith.constant 1 : index
    %c0_66 = arith.constant 0 : index
    %c0_67 = arith.constant 0 : index
    %227 = vector.load %arg0[%c1_65, %c0_66, %c0_67] : memref<8x8x16xf32, #tpu.memory_space<vmem>>, vector<1x8x16xf32>
    %228 = vector.shape_cast %227 : vector<1x8x16xf32> to vector<8x16xf32>
    %229 = tpu.concatenate %226, %215, %228, %220 in 1 : vector<8x16xf32>, vector<8x32xf32>, vector<8x16xf32>, vector<8x32xf32> -> vector<8x96xf32>
    %230 = arith.truncf %229 : vector<8x96xf32> to vector<8x96xbf16>
    %cst_68 = arith.constant dense<0.000000e+00> : vector<8x256xf32>
    %231 = tpu.matmul %230, %0, %cst_68 {dimension_numbers = #tpu.dot_dimension_numbers<[1], [0], [0], [1], [0, 0, 1, 1], [], []>} : vector<8x96xbf16>, vector<96x256xbf16>, vector<8x256xf32> -> vector<8x256xf32>
    %232 = vector.broadcast %1 : vector<1x256xf32> to vector<8x256xf32>
    %233 = arith.addf %231, %232 : vector<8x256xf32>
    %234 = arith.negf %233 : vector<8x256xf32>
    %235 = math.exp %234 : vector<8x256xf32>
    %cst_69 = arith.constant 1.000000e+00 : f32
    %236 = vector.broadcast %cst_69 : f32 to vector<8x256xf32>
    %237 = arith.addf %236, %235 : vector<8x256xf32>
    %238 = arith.divf %236, %237 : vector<8x256xf32>
    %239 = math.tanh %233 : vector<8x256xf32>
    %240 = vector.extract_strided_slice %238 {offsets = [0, 0], sizes = [8, 32], strides = [1, 1]} : vector<8x256xf32> to vector<8x32xf32>
    %241 = vector.extract_strided_slice %238 {offsets = [0, 32], sizes = [8, 32], strides = [1, 1]} : vector<8x256xf32> to vector<8x32xf32>
    %242 = vector.extract_strided_slice %238 {offsets = [0, 96], sizes = [8, 32], strides = [1, 1]} : vector<8x256xf32> to vector<8x32xf32>
    %243 = vector.extract_strided_slice %239 {offsets = [0, 64], sizes = [8, 32], strides = [1, 1]} : vector<8x256xf32> to vector<8x32xf32>
    %244 = vector.extract_strided_slice %238 {offsets = [0, 128], sizes = [8, 32], strides = [1, 1]} : vector<8x256xf32> to vector<8x32xf32>
    %245 = vector.extract_strided_slice %238 {offsets = [0, 160], sizes = [8, 32], strides = [1, 1]} : vector<8x256xf32> to vector<8x32xf32>
    %246 = vector.extract_strided_slice %238 {offsets = [0, 224], sizes = [8, 32], strides = [1, 1]} : vector<8x256xf32> to vector<8x32xf32>
    %247 = vector.extract_strided_slice %239 {offsets = [0, 192], sizes = [8, 32], strides = [1, 1]} : vector<8x256xf32> to vector<8x32xf32>
    %248 = arith.mulf %241, %213 : vector<8x32xf32>
    %249 = arith.mulf %240, %243 : vector<8x32xf32>
    %250 = arith.addf %248, %249 : vector<8x32xf32>
    %251 = math.tanh %250 : vector<8x32xf32>
    %252 = arith.mulf %242, %251 : vector<8x32xf32>
    %253 = arith.mulf %245, %218 : vector<8x32xf32>
    %254 = arith.mulf %244, %247 : vector<8x32xf32>
    %255 = arith.addf %253, %254 : vector<8x32xf32>
    %256 = math.tanh %255 : vector<8x32xf32>
    %257 = arith.mulf %246, %256 : vector<8x32xf32>
    %258 = tpu.concatenate %252, %250, %257, %255 in 1 : vector<8x32xf32>, vector<8x32xf32>, vector<8x32xf32>, vector<8x32xf32> -> vector<8x128xf32>
    %c6_70 = arith.constant 6 : index
    %c0_71 = arith.constant 0 : index
    %c0_72 = arith.constant 0 : index
    %259 = vector.load %arg3[%c6_70, %c0_71, %c0_72] : memref<8x8x128xf32, #tpu.memory_space<vmem>>, vector<1x8x128xf32>
    %260 = vector.shape_cast %259 : vector<1x8x128xf32> to vector<8x128xf32>
    %261 = vector.shape_cast %258 : vector<8x128xf32> to vector<1x8x128xf32>
    tpu.vector_store %arg3[%c6_70, %c0_71, %c0_72], %261 {strides = array<i32>} : memref<8x8x128xf32, #tpu.memory_space<vmem>>, vector<1x8x128xf32>,
    %c7_73 = arith.constant 7 : index
    %c0_74 = arith.constant 0 : index
    %c0_75 = arith.constant 0 : index
    %262 = vector.load %arg0[%c7_73, %c0_74, %c0_75] : memref<8x8x16xf32, #tpu.memory_space<vmem>>, vector<1x8x16xf32>
    %263 = vector.shape_cast %262 : vector<1x8x16xf32> to vector<8x16xf32>
    %c0_76 = arith.constant 0 : index
    %c0_77 = arith.constant 0 : index
    %c0_78 = arith.constant 0 : index
    %264 = vector.load %arg0[%c0_76, %c0_77, %c0_78] : memref<8x8x16xf32, #tpu.memory_space<vmem>>, vector<1x8x16xf32>
    %265 = vector.shape_cast %264 : vector<1x8x16xf32> to vector<8x16xf32>
    %266 = tpu.concatenate %263, %252, %265, %257 in 1 : vector<8x16xf32>, vector<8x32xf32>, vector<8x16xf32>, vector<8x32xf32> -> vector<8x96xf32>
    %267 = arith.truncf %266 : vector<8x96xf32> to vector<8x96xbf16>
    %cst_79 = arith.constant dense<0.000000e+00> : vector<8x256xf32>
    %268 = tpu.matmul %267, %0, %cst_79 {dimension_numbers = #tpu.dot_dimension_numbers<[1], [0], [0], [1], [0, 0, 1, 1], [], []>} : vector<8x96xbf16>, vector<96x256xbf16>, vector<8x256xf32> -> vector<8x256xf32>
    %269 = vector.broadcast %1 : vector<1x256xf32> to vector<8x256xf32>
    %270 = arith.addf %268, %269 : vector<8x256xf32>
    %271 = arith.negf %270 : vector<8x256xf32>
    %272 = math.exp %271 : vector<8x256xf32>
    %cst_80 = arith.constant 1.000000e+00 : f32
    %273 = vector.broadcast %cst_80 : f32 to vector<8x256xf32>
    %274 = arith.addf %273, %272 : vector<8x256xf32>
    %275 = arith.divf %273, %274 : vector<8x256xf32>
    %276 = math.tanh %270 : vector<8x256xf32>
    %277 = vector.extract_strided_slice %275 {offsets = [0, 0], sizes = [8, 32], strides = [1, 1]} : vector<8x256xf32> to vector<8x32xf32>
    %278 = vector.extract_strided_slice %275 {offsets = [0, 32], sizes = [8, 32], strides = [1, 1]} : vector<8x256xf32> to vector<8x32xf32>
    %279 = vector.extract_strided_slice %275 {offsets = [0, 96], sizes = [8, 32], strides = [1, 1]} : vector<8x256xf32> to vector<8x32xf32>
    %280 = vector.extract_strided_slice %276 {offsets = [0, 64], sizes = [8, 32], strides = [1, 1]} : vector<8x256xf32> to vector<8x32xf32>
    %281 = vector.extract_strided_slice %275 {offsets = [0, 128], sizes = [8, 32], strides = [1, 1]} : vector<8x256xf32> to vector<8x32xf32>
    %282 = vector.extract_strided_slice %275 {offsets = [0, 160], sizes = [8, 32], strides = [1, 1]} : vector<8x256xf32> to vector<8x32xf32>
    %283 = vector.extract_strided_slice %275 {offsets = [0, 224], sizes = [8, 32], strides = [1, 1]} : vector<8x256xf32> to vector<8x32xf32>
    %284 = vector.extract_strided_slice %276 {offsets = [0, 192], sizes = [8, 32], strides = [1, 1]} : vector<8x256xf32> to vector<8x32xf32>
    %285 = arith.mulf %278, %250 : vector<8x32xf32>
    %286 = arith.mulf %277, %280 : vector<8x32xf32>
    %287 = arith.addf %285, %286 : vector<8x32xf32>
    %288 = math.tanh %287 : vector<8x32xf32>
    %289 = arith.mulf %279, %288 : vector<8x32xf32>
    %290 = arith.mulf %282, %255 : vector<8x32xf32>
    %291 = arith.mulf %281, %284 : vector<8x32xf32>
    %292 = arith.addf %290, %291 : vector<8x32xf32>
    %293 = math.tanh %292 : vector<8x32xf32>
    %294 = arith.mulf %283, %293 : vector<8x32xf32>
    %295 = tpu.concatenate %289, %287, %294, %292 in 1 : vector<8x32xf32>, vector<8x32xf32>, vector<8x32xf32>, vector<8x32xf32> -> vector<8x128xf32>
    %c7_81 = arith.constant 7 : index
    %c0_82 = arith.constant 0 : index
    %c0_83 = arith.constant 0 : index
    %296 = vector.load %arg3[%c7_81, %c0_82, %c0_83] : memref<8x8x128xf32, #tpu.memory_space<vmem>>, vector<1x8x128xf32>
    %297 = vector.shape_cast %296 : vector<1x8x128xf32> to vector<8x128xf32>
    %298 = vector.shape_cast %295 : vector<8x128xf32> to vector<1x8x128xf32>
    tpu.vector_store %arg3[%c7_81, %c0_82, %c0_83], %298 {strides = array<i32>} : memref<8x8x128xf32, #tpu.memory_space<vmem>>, vector<1x8x128xf32>,
    return
  }
}

</mosaic_0001>

<bundles_post_ra>
// kernel: bilstm_forward.1
= control target key start
LH: loop header
LB: loop body
LE: loop exit
PB: predicated region body
PF: predicated region fallthrough
CT: control target
= control target key end

     0   :  { %8 = vsyncpa [#allocation3], 0  ;;  %s2001_s0 = inlined_call_operand.hbm [shape: f32[8,8,16], index: 0, kind: input, shape index: {}]   ;;  %s2002_s1 = inlined_call_operand.hbm [shape: bf16[96,256], index: 1, kind: input, shape index: {}]   ;;  %s2003_s2 = inlined_call_operand.hbm [shape: f32[1,256], index: 2, kind: input, shape index: {}]   ;;  %s2004_s3 = inlined_call_operand.hbm [shape: f32[8,8,128], index: 3, kind: output, shape index: {}]  }
   0x1   :  { %9 = vsyncpa [#allocation6], 0 }
   0x2   :  { %10 = vsyncpa [#allocation4], 0  ;;  %s1464_s12 = smov [#allocation5]   ;;  %s1465_s14 = smov [#allocation2]  }
   0x3   :  { %s28_s13 = sshll.u32 %s1464_s12, 4  ;;  %s16_s15 = sshll.u32 %s1465_s14, 4  ;;  %s29_s13 = int_to_ptr.vmem [resolvable:$true] %s28_s13  ;;  %s1495_s15 = int_to_ptr.vmem [resolvable:$true] %s16_s15 }
   0x4   :  { %s1370_s18 = scalar_lea.hbm %s2002_s1, 1536 }
   0x5   :  { %p1371_p0 = scmp.ne.s32.totalorder %s2002_s1, %s1370_s18  ;;  %p1374_p1 = scmp.lt.u32.totalorder %s1370_s18, %s2002_s1 }
   0x7   :  { %p1376_p2 = pnand %p1374_p1, %p1371_p0 }
   0x9   :  { %1379 = shalt.err (!%p1376_p2)
}
   0xa   :  { %s1380_s23 = scalar_lea.vmem %s29_s13, 1536  ;;  %p1385_p4 = scmp.lt.s32.totalorder %s29_s13, %s29_s13 }
   0xb   :  { %p1381_p3 = scmp.ne.s32.totalorder %s29_s13, %s1380_s23  ;;  %p1386_p5 = scmp.lt.s32.totalorder %s1380_s23, %s1380_s23 }
   0xd   :  { %p1387_p6 = por %p1386_p5, %p1385_p4 }
   0xf   :  { %p1388_p7 = pnand %p1387_p6, %p1381_p3 }
  0x11   :  { %1391 = shalt.err (!%p1388_p7)
}
  0x12   :  { %s1466_s24 = smov 128   ;;  %s1467_s25 = smov 8  }
  0x13   :  { %34 = dma.hbm_to_vmem [thread:$0]  %s2002_s1, 1536, %s29_s13, [#allocation6], %s1466_s24, %s1466_s24, %s1467_s25  }
  0x14   :  { %s1392_s30 = scalar_lea.hbm %s2001_s0, 1024 }
  0x15   :  { %p1393_p8 = scmp.ne.s32.totalorder %s2001_s0, %s1392_s30  ;;  %p1396_p9 = scmp.lt.u32.totalorder %s1392_s30, %s2001_s0 }
  0x17   :  { %p1398_p10 = pnand %p1396_p9, %p1393_p8 }
  0x19   :  { %1401 = shalt.err (!%p1398_p10)
}
  0x1a   :  { %s1402_s8 = scalar_lea.vmem %s1495_s15, 1024  ;;  %p1407_p12 = scmp.lt.s32.totalorder %s1495_s15, %s1495_s15 }
  0x1b   :  { %p1403_p11 = scmp.ne.s32.totalorder %s1495_s15, %s1402_s8  ;;  %p1408_p13 = scmp.lt.s32.totalorder %s1402_s8, %s1402_s8 }
  0x1d   :  { %p1409_p0 = por %p1408_p13, %p1407_p12 }
  0x1f   :  { %p1410_p1 = pnand %p1409_p0, %p1403_p11 }
  0x21   :  { %1413 = shalt.err (!%p1410_p1)
}
  0x22   :  { %22 = dma.hbm_to_vmem [thread:$0]  %s2001_s0, 1024, %s1495_s15, [#allocation3], %s1466_s24, %s1466_s24, %s1467_s25  }
  0x23   :  { %s1468_s10 = smov [#allocation7]   ;;  %s1414_s14 = scalar_lea.hbm %s2003_s2, 32 }
  0x24   :  { %s41_s11 = sshll.u32 %s1468_s10, 4  ;;  %p1415_p2 = scmp.ne.s32.totalorder %s2003_s2, %s1414_s14  ;;  %s42_s11 = int_to_ptr.vmem [resolvable:$true] %s41_s11 }
  0x25   :  { %p1418_p3 = scmp.lt.u32.totalorder %s1414_s14, %s2003_s2 }
  0x27   :  { %p1420_p4 = pnand %p1418_p3, %p1415_p2 }
  0x29   :  { %1423 = shalt.err (!%p1420_p4)
}
  0x2a   :  { %s1424_s20 = scalar_lea.vmem %s42_s11, 32  ;;  %p1429_p6 = scmp.lt.s32.totalorder %s42_s11, %s42_s11 }
  0x2b   :  { %p1425_p5 = scmp.ne.s32.totalorder %s42_s11, %s1424_s20  ;;  %p1430_p7 = scmp.lt.s32.totalorder %s1424_s20, %s1424_s20 }
  0x2d   :  { %p1431_p8 = por %p1430_p7, %p1429_p6 }
  0x2f   :  { %p1432_p9 = pnand %p1431_p8, %p1425_p5 }
  0x31   :  { %1435 = shalt.err (!%p1432_p9)
}
  0x32   :  { %44 = dma.hbm_to_vmem [thread:$0]  %s2003_s2, 32, %s42_s11, [#allocation6]  }
  0x33   :  { %1458 = dma.done.wait [#allocation3], 1024  }
  0x34   :  { %1459 = vsyncadd [#allocation3], 4294966272 }
  0x35   :  { %1460 = dma.done.wait [#allocation6], 1568  }
  0x36   :  { %1461 = vsyncadd [#allocation6], 4294965728  ;;  %v1469_v0 = vmov 0   ;;  %v70_v1 = vld [vmem:[#allocation2 + $0x38] sm:$0xff]  ;;  %s1470_s21 = smov 48   ;;  %vm75_vm0 = vcmask 130048   ;;  %v83_v20 = vlaneseq }
  0x37   :  { %189 = vmatprep.mubr.bf16.mxu0 %v1469_v0  ;;  %313 = vmatprep.mubr.bf16.mxu1 %v1469_v0  ;;  %v1547_v2 = vld [vmem:[#allocation5 + $0x4] ss:$8 sps:$4 sm:$0xff]   ;;  %v1549_v3 = vld [vmem:[#allocation5] ss:$8 sps:$4 sm:$0xff]   ;;  %v1551_v4 = vld [vmem:[#allocation5 + $0x14] ss:$8 sps:$4 sm:$0xff]  }
  0x38   :  { %72 = vrot.lane.b32.xlu0 %v70_v1, %s1470_s21  ;;  %157 = vmatprep.subr.bf16.mxu0 %v1547_v2  ;;  %v1556_v5 = vld [vmem:[#allocation5 + $0x10] ss:$8 sps:$4 sm:$0xff]   ;;  %v1560_v6 = vld [vmem:[#allocation5 + $0x24] ss:$8 sps:$4 sm:$0xff]   ;;  %v1564_v7 = vld [vmem:[#allocation5 + $0x20] ss:$8 sps:$4 sm:$0xff]  }
  0x39   :  { %281 = vmatprep.subr.bf16.mxu1 %v1547_v2  ;;  %158 = vmatpush1.bf16.msra.mxu0 %v1549_v3  ;;  %v1568_v8 = vld [vmem:[#allocation5 + $0x34] ss:$8 sps:$4 sm:$0xff]   ;;  %v1572_v9 = vld [vmem:[#allocation5 + $0x30] ss:$8 sps:$4 sm:$0xff]   ;;  %v1576_v10 = vld [vmem:[#allocation5 + $0x44] ss:$8 sps:$4 sm:$0xff]  }
  0x3a   :  { %282 = vmatpush1.bf16.msra.mxu1 %v1549_v3  ;;  %159 = vmatprep.subr.bf16.mxu0 %v1551_v4  ;;  %v1580_v11 = vld [vmem:[#allocation5 + $0x40] ss:$8 sps:$4 sm:$0xff]   ;;  %v1584_v12 = vld [vmem:[#allocation5 + $0x54] ss:$8 sps:$4 sm:$0xff]   ;;  %v1588_v13 = vld [vmem:[#allocation5 + $0x50] ss:$8 sps:$4 sm:$0xff]  }
  0x3b   :  { %283 = vmatprep.subr.bf16.mxu1 %v1551_v4  ;;  %v1597_v14 = vld [vmem:[#allocation2] sm:$0xff]  ;;  %vm77_vm1 = vcmask 392192   ;;  %vm79_vm2 = vcmask 523264   ;;  %vm153_vm3 = vcmask 785408   ;;  %v84_v21 = vshrl.u32 %v83_v20, 7  ;;  %s1471_s2 = smov 64  }
  0x3c   :  { %v76_v15 = vsel %vm75_vm0, %v1597_v14, 0.0  ;;  %v67_v23 = vld [vmem:[#allocation7] sm:$0x3]  ;;  %s1472_s22 = smov 32   ;;  %v1635_v55 = vld [vmem:[#allocation2 + $0x30] sm:$0xff]  ;;  %s1473_s23 = smov 96  }
  0x3d   :  { %160 = vmatpush1.bf16.msra.mxu0 %v1556_v5  ;;  %v85_v22 = vsub.s32 0, %v84_v21  ;;  %v89_v24 = vsub.s32 1, %v84_v21  ;;  %v1643_v61 = vld [vmem:[#allocation2 + $0x8] sm:$0xff]  ;;  %vm258_vm4 = vcmask 261120   ;;  %s1474_s26 = smov [#allocation8]  }
  0x3e   :  { %284 = vmatpush1.bf16.msra.mxu1 %v1556_v5  ;;  %161 = vmatprep.subr.bf16.mxu0 %v1560_v6  ;;  %s1128_s27 = sshll.u32 %s1474_s26, 4  ;;  %s1129_s27 = int_to_ptr.vmem [resolvable:$true] %s1128_s27 }
  0x3f   :  { %285 = vmatprep.subr.bf16.mxu1 %v1560_v6  ;;  %v1617_v25 = vrot.slane %v67_v23, %v85_v22  ;;  %v1619_v26 = vrot.slane %v67_v23, %v89_v24  ;;  %s1436_s28 = scalar_lea.vmem %s1129_s27, 1024  ;;  %p1441_p11 = scmp.lt.s32.totalorder %s1129_s27, %s1129_s27 }
  0x40   :  { %p1437_p10 = scmp.ne.s32.totalorder %s1129_s27, %s1436_s28  ;;  %p1442_p12 = scmp.lt.s32.totalorder %s1436_s28, %s1436_s28 }
  0x41   :  { %162 = vmatpush1.bf16.msra.mxu0 %v1564_v7 }
  0x42   :  { %286 = vmatpush1.bf16.msra.mxu1 %v1564_v7  ;;  %163 = vmatprep.subr.bf16.mxu0 %v1568_v8  ;;  %p1443_p13 = por %p1442_p12, %p1441_p11 }
  0x43   :  { %287 = vmatprep.subr.bf16.mxu1 %v1568_v8 }
  0x44   :  { %p1444_p0 = pnand %p1443_p13, %p1437_p10 }
  0x45   :  { %164 = vmatpush1.bf16.msra.mxu0 %v1572_v9 }
  0x46   :  { %288 = vmatpush1.bf16.msra.mxu1 %v1572_v9  ;;  %165 = vmatprep.subr.bf16.mxu0 %v1576_v10 }
  0x47   :  { %289 = vmatprep.subr.bf16.mxu1 %v1576_v10 }
  0x49   :  { %166 = vmatpush1.bf16.msra.mxu0 %v1580_v11 }
  0x4a   :  { %290 = vmatpush1.bf16.msra.mxu1 %v1580_v11  ;;  %167 = vmatprep.subr.bf16.mxu0 %v1584_v12 }
  0x4b   :  { %291 = vmatprep.subr.bf16.mxu1 %v1584_v12 }
  0x4d   :  { %168 = vmatpush1.bf16.msra.mxu0 %v1588_v13 }
  0x4e   :  { %292 = vmatpush1.bf16.msra.mxu1 %v1588_v13  ;;  %405 = vmatprep.subr.bf16.mxu0 %v1547_v2 }
  0x4f   :  { %529 = vmatprep.subr.bf16.mxu1 %v1547_v2 }
  0xaa   :  { %v73_v16 = vpop.permute.xlu0 %72 }
  0xab   :  { %v78_v17 = vsel %vm77_vm1, %v76_v15, %v73_v16 }
  0xac   :  { %v80_v18 = vsel %vm79_vm2, %v78_v17, 0.0 }
  0xad   :  { %v81_v19 = vpack.c.bf16 %v80_v18, %v80_v18 }
  0xaf   :  { %1153 = vmatmul.mubr.msk.bf16.vlgmr.msra.gmra.mrb[0].mxu0 %vm153_vm3, %v81_v19 }
  0xb0   :  { %406 = vmatpush1.bf16.msra.mxu0 %v1549_v3  ;;  %437 = vmatprep.mubr.bf16.mxu0 %v1469_v0 }
  0xb1   :  { %407 = vmatprep.subr.bf16.mxu0 %v1551_v4 }
  0xb4   :  { %408 = vmatpush1.bf16.msra.mxu0 %v1556_v5 }
  0xb5   :  { %409 = vmatprep.subr.bf16.mxu0 %v1560_v6 }
  0xb8   :  { %410 = vmatpush1.bf16.msra.mxu0 %v1564_v7 }
  0xb9   :  { %411 = vmatprep.subr.bf16.mxu0 %v1568_v8 }
  0xbc   :  { %412 = vmatpush1.bf16.msra.mxu0 %v1572_v9 }
  0xbd   :  { %413 = vmatprep.subr.bf16.mxu0 %v1576_v10 }
  0xc0   :  { %414 = vmatpush1.bf16.msra.mxu0 %v1580_v11 }
  0xc1   :  { %415 = vmatprep.subr.bf16.mxu0 %v1584_v12 }
  0xc4   :  { %416 = vmatpush1.bf16.msra.mxu0 %v1588_v13 }
  0xc5   :  { %651 = vmatprep.subr.bf16.mxu0 %v1547_v2 }
 0x182   :  { %v191_v27 = vpop.f32.mrb[0].mxu0 }
 0x183   :  { %v192_v28 = vadd.f32 %v191_v27, %v1617_v25  ;;  %v193_v29 = vpop.f32.mrb[1].mxu0 }
 0x184   :  { %v194_v30 = vadd.f32 %v193_v29, %v1619_v26  ;;  %v195_v31 = vpop.f32.mrb[2].mxu0 }
 0x185   :  { %1241 = vtanh.f32 %v192_v28  ;;  %v196_v32 = vpop.f32.mrb[3].mxu0  ;;  %v1154_v35 = vmul.f32 -1.442695, %v192_v28 }
 0x186   :  { %1243 = vtanh.f32 %v194_v30  ;;  %v1155_v36 = vmul.f32 -1.442695, %v194_v30 }
 0x187   :  { %1245 = vpow2.f32 %v1154_v35 }
 0x188   :  { %1247 = vpow2.f32 %v1155_v36 }
 0x18f   :  { %v1242_v33 = vpop.eup %1241 }
 0x190   :  { %v1244_v34 = vpop.eup %1243  ;;  %214 = vrot.lane.b32.xlu0 %v1242_v33, %s1471_s2 }
 0x191   :  { %231 = vrot.lane.b32.xlu1 %v1244_v34, %s1471_s2  ;;  %v1246_v37 = vpop.eup %1245 }
 0x192   :  { %v1248_v38 = vpop.eup %1247  ;;  %v204_v39 = vadd.f32 1.0, %v1246_v37 }
 0x193   :  { %v205_v40 = vadd.f32 1.0, %v1248_v38 }
 0x194   :  { %1249 = vrcp.f32 %v204_v39 }
 0x195   :  { %1251 = vrcp.f32 %v205_v40 }
 0x19e   :  { %v1250_v41 = vpop.eup %1249 }
 0x19f   :  { %v1252_v43 = vpop.eup %1251  ;;  %v212_v47 = vmul.f32 0.0, %v1250_v41 }
 0x1a0   :  { %v229_v49 = vmul.f32 0.0, %v1252_v43 }
 0x202   :  { %v215_v42 = vpop.permute.xlu0 %214 }
 0x203   :  { %v217_v44 = vmul.f32 %v1250_v41, %v215_v42  ;;  %v232_v45 = vpop.permute.xlu1 %231 }
 0x204   :  { %v234_v46 = vmul.f32 %v1252_v43, %v232_v45 }
 0x205   :  { %219 = vrot.lane.b32.xlu1 %v217_v44, %s1472_s22 }
 0x206   :  { %236 = vrot.lane.b32.xlu0 %v234_v46, %s1472_s22 }
 0x277   :  { %v220_v48 = vpop.permute.xlu1 %219 }
 0x278   :  { %v1627_v50 = vadd.f32 %v220_v48, %v212_v47  ;;  %v237_v51 = vpop.permute.xlu0 %236 }
 0x279   :  { %v1629_v52 = vadd.f32 %v237_v51, %v229_v49  ;;  %v1682_v51 = vld [vmem:[#allocation2 + $0x28] sm:$0xff] }
 0x27a   :  { %1253 = vtanh.f32 %v1627_v50 }
 0x27b   :  { %1255 = vtanh.f32 %v1629_v52 }
 0x284   :  { %v1254_v53 = vpop.eup %1253 }
 0x285   :  { %v1256_v54 = vpop.eup %1255  ;;  %225 = vrot.lane.b32.xlu1 %v1254_v53, %s1471_s2 }
 0x286   :  { %242 = vrot.lane.b32.xlu0 %v1256_v54, %s1471_s2 }
 0x2f7   :  { %v226_v56 = vpop.permute.xlu1 %225 }
 0x2f8   :  { %v1637_v57 = vmul.f32 %v1250_v41, %v226_v56  ;;  %v243_v58 = vpop.permute.xlu0 %242 }
 0x2f9   :  { %v245_v59 = vmul.f32 %v1252_v43, %v243_v58 }
 0x2fa   :  { %v1188_v60 = vpack.i.bf16 %v1635_v55, %v1637_v57 }
 0x2fb   :  { %251 = vrot.lane.b32.xlu0 %v245_v59, %s1473_s23 }
 0x2fc   :  { %1189 = vrot.lane.b32.xlu1 %v1188_v60, %s1470_s21  ;;  %v1690_v60 = vld [vmem:[#allocation2 + $0x10] sm:$0xff] }
 0x36d   :  { %v1647_v16 = vpop.permute.xlu0 %251 }
 0x36e   :  { %v1190_v62 = vpop.permute.xlu1 %1189 }
 0x36f   :  { %v1192_v63 = vunpack.i.h.bf16 %v1190_v62  ;;  %v1191_v1 = vunpack.i.l.bf16 %v1190_v62 }
 0x371   :  { %v274_v15 = vsel %vm75_vm0, %v1643_v61, %v1191_v1 }
 0x372   :  { %v275_v17 = vsel %vm77_vm1, %v274_v15, %v1192_v63 }
 0x373   :  { %v276_v18 = vsel %vm79_vm2, %v275_v17, %v1647_v16 }
 0x374   :  { %v277_v19 = vpack.c.bf16 %v276_v18, %v276_v18 }
 0x376   :  { %1156 = vmatmul.mubr.msk.bf16.vlgmr.msra.gmra.mrb[0].mxu1 %vm153_vm3, %v277_v19 }
 0x377   :  { %530 = vmatpush1.bf16.msra.mxu1 %v1549_v3  ;;  %561 = vmatprep.mubr.bf16.mxu1 %v1469_v0 }
 0x378   :  { %531 = vmatprep.subr.bf16.mxu1 %v1551_v4 }
 0x37b   :  { %532 = vmatpush1.bf16.msra.mxu1 %v1556_v5 }
 0x37c   :  { %533 = vmatprep.subr.bf16.mxu1 %v1560_v6 }
 0x37f   :  { %534 = vmatpush1.bf16.msra.mxu1 %v1564_v7 }
 0x380   :  { %535 = vmatprep.subr.bf16.mxu1 %v1568_v8 }
 0x383   :  { %536 = vmatpush1.bf16.msra.mxu1 %v1572_v9 }
 0x384   :  { %537 = vmatprep.subr.bf16.mxu1 %v1576_v10 }
 0x387   :  { %538 = vmatpush1.bf16.msra.mxu1 %v1580_v11 }
 0x388   :  { %539 = vmatprep.subr.bf16.mxu1 %v1584_v12 }
 0x38b   :  { %540 = vmatpush1.bf16.msra.mxu1 %v1588_v13 }
 0x38c   :  { %773 = vmatprep.subr.bf16.mxu1 %v1547_v2 }
 0x449   :  { %v315_v20 = vpop.f32.mrb[0].mxu1 }
 0x44a   :  { %v316_v21 = vadd.f32 %v315_v20, %v1617_v25  ;;  %v317_v22 = vpop.f32.mrb[1].mxu1 }
 0x44b   :  { %v318_v23 = vadd.f32 %v317_v22, %v1619_v26  ;;  %v319_v24 = vpop.f32.mrb[2].mxu1 }
 0x44c   :  { %1257 = vtanh.f32 %v316_v21  ;;  %v320_v27 = vpop.f32.mrb[3].mxu1  ;;  %v1157_v30 = vmul.f32 -1.442695, %v316_v21 }
 0x44d   :  { %1259 = vtanh.f32 %v318_v23  ;;  %v1158_v31 = vmul.f32 -1.442695, %v318_v23 }
 0x44e   :  { %1261 = vpow2.f32 %v1157_v30 }
 0x44f   :  { %1263 = vpow2.f32 %v1158_v31 }
 0x456   :  { %v1258_v28 = vpop.eup %1257 }
 0x457   :  { %v1260_v29 = vpop.eup %1259  ;;  %338 = vrot.lane.b32.xlu1 %v1258_v28, %s1471_s2 }
 0x458   :  { %355 = vrot.lane.b32.xlu0 %v1260_v29, %s1471_s2  ;;  %v1262_v32 = vpop.eup %1261 }
 0x459   :  { %v1264_v33 = vpop.eup %1263  ;;  %v328_v34 = vadd.f32 1.0, %v1262_v32 }
 0x45a   :  { %v329_v35 = vadd.f32 1.0, %v1264_v33 }
 0x45b   :  { %1265 = vrcp.f32 %v328_v34 }
 0x45c   :  { %1267 = vrcp.f32 %v329_v35 }
 0x465   :  { %v1266_v36 = vpop.eup %1265 }
 0x466   :  { %v1268_v38 = vpop.eup %1267  ;;  %v336_v42 = vmul.f32 %v1266_v36, %v1627_v50 }
 0x467   :  { %v353_v44 = vmul.f32 %v1268_v38, %v1629_v52 }
 0x4c9   :  { %v339_v37 = vpop.permute.xlu1 %338 }
 0x4ca   :  { %v341_v39 = vmul.f32 %v1266_v36, %v339_v37  ;;  %v356_v40 = vpop.permute.xlu0 %355 }
 0x4cb   :  { %v358_v41 = vmul.f32 %v1268_v38, %v356_v40 }
 0x4cc   :  { %343 = vrot.lane.b32.xlu1 %v341_v39, %s1472_s22 }
 0x4cd   :  { %360 = vrot.lane.b32.xlu0 %v358_v41, %s1472_s22 }
 0x53e   :  { %v344_v43 = vpop.permute.xlu1 %343 }
 0x53f   :  { %v1674_v45 = vadd.f32 %v344_v43, %v336_v42  ;;  %v361_v46 = vpop.permute.xlu0 %360 }
 0x540   :  { %v1676_v47 = vadd.f32 %v361_v46, %v353_v44 }
 0x541   :  { %1269 = vtanh.f32 %v1674_v45 }
 0x542   :  { %1271 = vtanh.f32 %v1676_v47 }
 0x54b   :  { %v1270_v48 = vpop.eup %1269 }
 0x54c   :  { %v1272_v49 = vpop.eup %1271  ;;  %349 = vrot.lane.b32.xlu1 %v1270_v48, %s1471_s2 }
 0x54d   :  { %366 = vrot.lane.b32.xlu0 %v1272_v49, %s1471_s2 }
 0x5be   :  { %v350_v53 = vpop.permute.xlu1 %349 }
 0x5bf   :  { %v1684_v54 = vmul.f32 %v1266_v36, %v350_v53  ;;  %v367_v56 = vpop.permute.xlu0 %366 }
 0x5c0   :  { %v369_v58 = vmul.f32 %v1268_v38, %v367_v56 }
 0x5c1   :  { %v1193_v59 = vpack.i.bf16 %v1682_v51, %v1684_v54 }
 0x5c2   :  { %375 = vrot.lane.b32.xlu0 %v369_v58, %s1473_s23 }
 0x5c3   :  { %1194 = vrot.lane.b32.xlu1 %v1193_v59, %s1470_s21  ;;  %v1729_v59 = vld [vmem:[#allocation2 + $0x20] sm:$0xff] }
 0x634   :  { %v1694_v17 = vpop.permute.xlu0 %375 }
 0x635   :  { %v1195_v62 = vpop.permute.xlu1 %1194 }
 0x636   :  { %v1197_v63 = vunpack.i.h.bf16 %v1195_v62  ;;  %v1196_v1 = vunpack.i.l.bf16 %v1195_v62 }
 0x638   :  { %v398_v15 = vsel %vm75_vm0, %v1690_v60, %v1196_v1 }
 0x639   :  { %v399_v18 = vsel %vm77_vm1, %v398_v15, %v1197_v63 }
 0x63a   :  { %v400_v19 = vsel %vm79_vm2, %v399_v18, %v1694_v17 }
 0x63b   :  { %v401_v20 = vpack.c.bf16 %v400_v19, %v400_v19  ;;  %v1737_v19 = vld [vmem:[#allocation2 + $0x18] sm:$0xff] }
 0x63d   :  { %1159 = vmatmul.mubr.msk.bf16.vlgmr.msra.gmra.mrb[4].mxu0 %vm153_vm3, %v401_v20 }
 0x63e   :  { %652 = vmatpush1.bf16.msra.mxu0 %v1549_v3  ;;  %683 = vmatprep.mubr.bf16.mxu0 %v1469_v0 }
 0x63f   :  { %653 = vmatprep.subr.bf16.mxu0 %v1551_v4 }
 0x642   :  { %654 = vmatpush1.bf16.msra.mxu0 %v1556_v5 }
 0x643   :  { %655 = vmatprep.subr.bf16.mxu0 %v1560_v6 }
 0x646   :  { %656 = vmatpush1.bf16.msra.mxu0 %v1564_v7 }
 0x647   :  { %657 = vmatprep.subr.bf16.mxu0 %v1568_v8 }
 0x64a   :  { %658 = vmatpush1.bf16.msra.mxu0 %v1572_v9 }
 0x64b   :  { %659 = vmatprep.subr.bf16.mxu0 %v1576_v10 }
 0x64e   :  { %660 = vmatpush1.bf16.msra.mxu0 %v1580_v11 }
 0x64f   :  { %661 = vmatprep.subr.bf16.mxu0 %v1584_v12 }
 0x652   :  { %662 = vmatpush1.bf16.msra.mxu0 %v1588_v13 }
 0x653   :  { %895 = vmatprep.subr.bf16.mxu0 %v1547_v2 }
 0x710   :  { %v439_v21 = vpop.f32.mrb[4].mxu0 }
 0x711   :  { %v440_v22 = vadd.f32 %v439_v21, %v1617_v25  ;;  %v441_v23 = vpop.f32.mrb[5].mxu0 }
 0x712   :  { %v442_v24 = vadd.f32 %v441_v23, %v1619_v26  ;;  %v443_v27 = vpop.f32.mrb[6].mxu0 }
 0x713   :  { %1273 = vtanh.f32 %v440_v22  ;;  %v444_v28 = vpop.f32.mrb[7].mxu0  ;;  %v1160_v31 = vmul.f32 -1.442695, %v440_v22 }
 0x714   :  { %1275 = vtanh.f32 %v442_v24  ;;  %v1161_v32 = vmul.f32 -1.442695, %v442_v24 }
 0x715   :  { %1277 = vpow2.f32 %v1160_v31 }
 0x716   :  { %1279 = vpow2.f32 %v1161_v32 }
 0x71d   :  { %v1274_v29 = vpop.eup %1273 }
 0x71e   :  { %v1276_v30 = vpop.eup %1275  ;;  %462 = vrot.lane.b32.xlu1 %v1274_v29, %s1471_s2 }
 0x71f   :  { %479 = vrot.lane.b32.xlu0 %v1276_v30, %s1471_s2  ;;  %v1278_v33 = vpop.eup %1277 }
 0x720   :  { %v1280_v34 = vpop.eup %1279  ;;  %v452_v35 = vadd.f32 1.0, %v1278_v33 }
 0x721   :  { %v453_v36 = vadd.f32 1.0, %v1280_v34 }
 0x722   :  { %1281 = vrcp.f32 %v452_v35 }
 0x723   :  { %1283 = vrcp.f32 %v453_v36 }
 0x72c   :  { %v1282_v37 = vpop.eup %1281 }
 0x72d   :  { %v1284_v39 = vpop.eup %1283  ;;  %v460_v43 = vmul.f32 %v1282_v37, %v1674_v45 }
 0x72e   :  { %v477_v46 = vmul.f32 %v1284_v39, %v1676_v47 }
 0x790   :  { %v463_v38 = vpop.permute.xlu1 %462 }
 0x791   :  { %v465_v40 = vmul.f32 %v1282_v37, %v463_v38  ;;  %v480_v41 = vpop.permute.xlu0 %479 }
 0x792   :  { %v482_v42 = vmul.f32 %v1284_v39, %v480_v41 }
 0x793   :  { %467 = vrot.lane.b32.xlu1 %v465_v40, %s1472_s22 }
 0x794   :  { %484 = vrot.lane.b32.xlu0 %v482_v42, %s1472_s22 }
 0x805   :  { %v468_v44 = vpop.permute.xlu1 %467 }
 0x806   :  { %v1721_v48 = vadd.f32 %v468_v44, %v460_v43  ;;  %v485_v49 = vpop.permute.xlu0 %484 }
 0x807   :  { %v1723_v53 = vadd.f32 %v485_v49, %v477_v46 }
 0x808   :  { %1285 = vtanh.f32 %v1721_v48 }
 0x809   :  { %1287 = vtanh.f32 %v1723_v53 }
 0x812   :  { %v1286_v56 = vpop.eup %1285 }
 0x813   :  { %v1288_v58 = vpop.eup %1287  ;;  %473 = vrot.lane.b32.xlu1 %v1286_v56, %s1471_s2 }
 0x814   :  { %490 = vrot.lane.b32.xlu0 %v1288_v58, %s1471_s2 }
 0x885   :  { %v474_v62 = vpop.permute.xlu1 %473 }
 0x886   :  { %v1731_v63 = vmul.f32 %v1282_v37, %v474_v62  ;;  %v491_v1 = vpop.permute.xlu0 %490 }
 0x887   :  { %v493_v15 = vmul.f32 %v1284_v39, %v491_v1 }
 0x888   :  { %v1198_v18 = vpack.i.bf16 %v1729_v59, %v1731_v63 }
 0x889   :  { %499 = vrot.lane.b32.xlu0 %v493_v15, %s1473_s23 }
 0x88a   :  { %1199 = vrot.lane.b32.xlu1 %v1198_v18, %s1470_s21 }
 0x8fb   :  { %v1741_v24 = vpop.permute.xlu0 %499 }
 0x8fc   :  { %v1200_v20 = vpop.permute.xlu1 %1199 }
 0x8fd   :  { %v1202_v21 = vunpack.i.h.bf16 %v1200_v20  ;;  %v1201_v22 = vunpack.i.l.bf16 %v1200_v20 }
 0x8ff   :  { %v522_v23 = vsel %vm75_vm0, %v1737_v19, %v1201_v22 }
 0x900   :  { %v523_v27 = vsel %vm77_vm1, %v522_v23, %v1202_v21 }
 0x901   :  { %v524_v28 = vsel %vm79_vm2, %v523_v27, %v1741_v24 }
 0x902   :  { %v525_v29 = vpack.c.bf16 %v524_v28, %v524_v28 }
 0x904   :  { %1162 = vmatmul.mubr.msk.bf16.vlgmr.msra.gmra.mrb[4].mxu1 %vm153_vm3, %v525_v29 }
 0x905   :  { %774 = vmatpush1.bf16.msra.mxu1 %v1549_v3  ;;  %805 = vmatprep.mubr.bf16.mxu1 %v1469_v0 }
 0x906   :  { %775 = vmatprep.subr.bf16.mxu1 %v1551_v4 }
 0x909   :  { %776 = vmatpush1.bf16.msra.mxu1 %v1556_v5 }
 0x90a   :  { %777 = vmatprep.subr.bf16.mxu1 %v1560_v6 }
 0x90d   :  { %778 = vmatpush1.bf16.msra.mxu1 %v1564_v7 }
 0x90e   :  { %779 = vmatprep.subr.bf16.mxu1 %v1568_v8 }
 0x911   :  { %780 = vmatpush1.bf16.msra.mxu1 %v1572_v9 }
 0x912   :  { %781 = vmatprep.subr.bf16.mxu1 %v1576_v10 }
 0x915   :  { %782 = vmatpush1.bf16.msra.mxu1 %v1580_v11 }
 0x916   :  { %783 = vmatprep.subr.bf16.mxu1 %v1584_v12 }
 0x919   :  { %784 = vmatpush1.bf16.msra.mxu1 %v1588_v13 }
 0x91a   :  { %1017 = vmatprep.subr.bf16.mxu1 %v1547_v2 }
 0x9d7   :  { %v563_v30 = vpop.f32.mrb[4].mxu1 }
 0x9d8   :  { %v564_v31 = vadd.f32 %v563_v30, %v1617_v25  ;;  %v565_v32 = vpop.f32.mrb[5].mxu1 }
 0x9d9   :  { %v566_v33 = vadd.f32 %v565_v32, %v1619_v26  ;;  %v567_v34 = vpop.f32.mrb[6].mxu1 }
 0x9da   :  { %1289 = vtanh.f32 %v564_v31  ;;  %v568_v35 = vpop.f32.mrb[7].mxu1  ;;  %v1163_v38 = vmul.f32 -1.442695, %v564_v31 }
 0x9db   :  { %1291 = vtanh.f32 %v566_v33  ;;  %v1164_v39 = vmul.f32 -1.442695, %v566_v33 }
 0x9dc   :  { %1293 = vpow2.f32 %v1163_v38 }
 0x9dd   :  { %1295 = vpow2.f32 %v1164_v39 }
 0x9e4   :  { %v1290_v36 = vpop.eup %1289 }
 0x9e5   :  { %v1292_v37 = vpop.eup %1291  ;;  %586 = vrot.lane.b32.xlu1 %v1290_v36, %s1471_s2 }
 0x9e6   :  { %603 = vrot.lane.b32.xlu0 %v1292_v37, %s1471_s2  ;;  %v1294_v2 = vpop.eup %1293 }
 0x9e7   :  { %v1296_v40 = vpop.eup %1295  ;;  %v576_v41 = vadd.f32 1.0, %v1294_v2 }
 0x9e8   :  { %v577_v42 = vadd.f32 1.0, %v1296_v40 }
 0x9e9   :  { %1297 = vrcp.f32 %v576_v41 }
 0x9ea   :  { %1299 = vrcp.f32 %v577_v42 }
 0x9f3   :  { %v1298_v43 = vpop.eup %1297 }
 0x9f4   :  { %v1300_v46 = vpop.eup %1299  ;;  %v584_v62 = vmul.f32 %v1298_v43, %v1721_v48 }
 0x9f5   :  { %v601_v15 = vmul.f32 %v1300_v46, %v1723_v53 }
 0xa57   :  { %v587_v44 = vpop.permute.xlu1 %586 }
 0xa58   :  { %v589_v49 = vmul.f32 %v1298_v43, %v587_v44  ;;  %v604_v56 = vpop.permute.xlu0 %603 }
 0xa59   :  { %v606_v58 = vmul.f32 %v1300_v46, %v604_v56 }
 0xa5a   :  { %591 = vrot.lane.b32.xlu1 %v589_v49, %s1472_s22 }
 0xa5b   :  { %608 = vrot.lane.b32.xlu0 %v606_v58, %s1472_s22 }
 0xacc   :  { %v592_v1 = vpop.permute.xlu1 %591 }
 0xacd   :  { %v1768_v18 = vadd.f32 %v592_v1, %v584_v62  ;;  %v609_v20 = vpop.permute.xlu0 %608 }
 0xace   :  { %v1770_v21 = vadd.f32 %v609_v20, %v601_v15 }
 0xacf   :  { %1301 = vtanh.f32 %v1768_v18 }
 0xad0   :  { %1303 = vtanh.f32 %v1770_v21 }
 0xad9   :  { %v1302_v22 = vpop.eup %1301 }
 0xada   :  { %v1304_v23 = vpop.eup %1303  ;;  %597 = vrot.lane.b32.xlu1 %v1302_v22, %s1471_s2 }
 0xadb   :  { %614 = vrot.lane.b32.xlu0 %v1304_v23, %s1471_s2 }
 0xb4c   :  { %v598_v27 = vpop.permute.xlu1 %597 }
 0xb4d   :  { %v1776_v28 = vmul.f32 %v1298_v43, %v598_v27  ;;  %v615_v29 = vpop.permute.xlu0 %614 }
 0xb4e   :  { %v617_v30 = vmul.f32 %v1300_v46, %v615_v29 }
 0xb4f   :  { %v1203_v31 = vpack.i.bf16 %v1737_v19, %v1776_v28 }
 0xb50   :  { %623 = vrot.lane.b32.xlu0 %v617_v30, %s1473_s23 }
 0xb51   :  { %1204 = vrot.lane.b32.xlu1 %v1203_v31, %s1470_s21 }
 0xbc2   :  { %v1784_v36 = vpop.permute.xlu0 %623 }
 0xbc3   :  { %v1205_v32 = vpop.permute.xlu1 %1204 }
 0xbc4   :  { %v1207_v33 = vunpack.i.h.bf16 %v1205_v32  ;;  %v1206_v34 = vunpack.i.l.bf16 %v1205_v32 }
 0xbc6   :  { %v644_v35 = vsel %vm75_vm0, %v1729_v59, %v1206_v34 }
 0xbc7   :  { %v645_v37 = vsel %vm77_vm1, %v644_v35, %v1207_v33 }
 0xbc8   :  { %v646_v38 = vsel %vm79_vm2, %v645_v37, %v1784_v36 }
 0xbc9   :  { %v647_v39 = vpack.c.bf16 %v646_v38, %v646_v38 }
 0xbcb   :  { %1165 = vmatmul.mubr.msk.bf16.vlgmr.msra.gmra.mrb[8].mxu0 %vm153_vm3, %v647_v39 }
 0xbcc   :  { %896 = vmatpush1.bf16.msra.mxu0 %v1549_v3  ;;  %927 = vmatprep.mubr.bf16.mxu0 %v1469_v0 }
 0xbcd   :  { %897 = vmatprep.subr.bf16.mxu0 %v1551_v4 }
 0xbd0   :  { %898 = vmatpush1.bf16.msra.mxu0 %v1556_v5 }
 0xbd1   :  { %899 = vmatprep.subr.bf16.mxu0 %v1560_v6 }
 0xbd4   :  { %900 = vmatpush1.bf16.msra.mxu0 %v1564_v7 }
 0xbd5   :  { %901 = vmatprep.subr.bf16.mxu0 %v1568_v8 }
 0xbd8   :  { %902 = vmatpush1.bf16.msra.mxu0 %v1572_v9 }
 0xbd9   :  { %903 = vmatprep.subr.bf16.mxu0 %v1576_v10 }
 0xbdc   :  { %904 = vmatpush1.bf16.msra.mxu0 %v1580_v11 }
 0xbdd   :  { %905 = vmatprep.subr.bf16.mxu0 %v1584_v12 }
 0xbe0   :  { %906 = vmatpush1.bf16.msra.mxu0 %v1588_v13 }
 0xc9e   :  { %v685_v59 = vpop.f32.mrb[8].mxu0 }
 0xc9f   :  { %v686_v19 = vadd.f32 %v685_v59, %v1617_v25  ;;  %v687_v2 = vpop.f32.mrb[9].mxu0 }
 0xca0   :  { %v688_v40 = vadd.f32 %v687_v2, %v1619_v26  ;;  %v689_v41 = vpop.f32.mrb[10].mxu0 }
 0xca1   :  { %1305 = vtanh.f32 %v686_v19  ;;  %v690_v42 = vpop.f32.mrb[11].mxu0  ;;  %v1166_v46 = vmul.f32 -1.442695, %v686_v19 }
 0xca2   :  { %1307 = vtanh.f32 %v688_v40  ;;  %v1167_v49 = vmul.f32 -1.442695, %v688_v40 }
 0xca3   :  { %1309 = vpow2.f32 %v1166_v46 }
 0xca4   :  { %1311 = vpow2.f32 %v1167_v49 }
 0xcab   :  { %v1306_v43 = vpop.eup %1305 }
 0xcac   :  { %v1308_v44 = vpop.eup %1307  ;;  %708 = vrot.lane.b32.xlu1 %v1306_v43, %s1471_s2 }
 0xcad   :  { %725 = vrot.lane.b32.xlu0 %v1308_v44, %s1471_s2  ;;  %v1310_v56 = vpop.eup %1309 }
 0xcae   :  { %v1312_v58 = vpop.eup %1311  ;;  %v698_v62 = vadd.f32 1.0, %v1310_v56 }
 0xcaf   :  { %v699_v1 = vadd.f32 1.0, %v1312_v58 }
 0xcb0   :  { %1313 = vrcp.f32 %v698_v62 }
 0xcb1   :  { %1315 = vrcp.f32 %v699_v1 }
 0xcba   :  { %v1314_v15 = vpop.eup %1313 }
 0xcbb   :  { %v1316_v22 = vpop.eup %1315  ;;  %v706_v30 = vmul.f32 %v1314_v15, %v1768_v18 }
 0xcbc   :  { %v723_v32 = vmul.f32 %v1316_v22, %v1770_v21 }
 0xd1e   :  { %v709_v20 = vpop.permute.xlu1 %708 }
 0xd1f   :  { %v711_v23 = vmul.f32 %v1314_v15, %v709_v20  ;;  %v726_v27 = vpop.permute.xlu0 %725 }
 0xd20   :  { %v728_v29 = vmul.f32 %v1316_v22, %v726_v27 }
 0xd21   :  { %713 = vrot.lane.b32.xlu1 %v711_v23, %s1472_s22 }
 0xd22   :  { %730 = vrot.lane.b32.xlu0 %v728_v29, %s1472_s22 }
 0xd93   :  { %v714_v31 = vpop.permute.xlu1 %713 }
 0xd94   :  { %v1810_v33 = vadd.f32 %v714_v31, %v706_v30  ;;  %v731_v34 = vpop.permute.xlu0 %730 }
 0xd95   :  { %v1812_v35 = vadd.f32 %v731_v34, %v723_v32 }
 0xd96   :  { %1317 = vtanh.f32 %v1810_v33 }
 0xd97   :  { %1319 = vtanh.f32 %v1812_v35 }
 0xda0   :  { %v1318_v37 = vpop.eup %1317 }
 0xda1   :  { %v1320_v38 = vpop.eup %1319  ;;  %719 = vrot.lane.b32.xlu1 %v1318_v37, %s1471_s2 }
 0xda2   :  { %736 = vrot.lane.b32.xlu0 %v1320_v38, %s1471_s2 }
 0xe13   :  { %v720_v39 = vpop.permute.xlu1 %719 }
 0xe14   :  { %v1818_v59 = vmul.f32 %v1314_v15, %v720_v39  ;;  %v737_v19 = vpop.permute.xlu0 %736 }
 0xe15   :  { %v739_v2 = vmul.f32 %v1316_v22, %v737_v19 }
 0xe16   :  { %v1208_v40 = vpack.i.bf16 %v1690_v60, %v1818_v59 }
 0xe17   :  { %745 = vrot.lane.b32.xlu0 %v739_v2, %s1473_s23 }
 0xe18   :  { %1209 = vrot.lane.b32.xlu1 %v1208_v40, %s1470_s21 }
 0xe89   :  { %v1826_v46 = vpop.permute.xlu0 %745 }
 0xe8a   :  { %v1210_v41 = vpop.permute.xlu1 %1209 }
 0xe8b   :  { %v1212_v42 = vunpack.i.h.bf16 %v1210_v41  ;;  %v1211_v43 = vunpack.i.l.bf16 %v1210_v41 }
 0xe8d   :  { %v766_v44 = vsel %vm75_vm0, %v1682_v51, %v1211_v43 }
 0xe8e   :  { %v767_v49 = vsel %vm77_vm1, %v766_v44, %v1212_v42 }
 0xe8f   :  { %v768_v56 = vsel %vm79_vm2, %v767_v49, %v1826_v46 }
 0xe90   :  { %v769_v58 = vpack.c.bf16 %v768_v56, %v768_v56 }
 0xe92   :  { %1168 = vmatmul.mubr.msk.bf16.vlgmr.msra.gmra.mrb[8].mxu1 %vm153_vm3, %v769_v58 }
 0xe93   :  { %1018 = vmatpush1.bf16.msra.mxu1 %v1549_v3  ;;  %1049 = vmatprep.mubr.bf16.mxu1 %v1469_v0 }
 0xe94   :  { %1019 = vmatprep.subr.bf16.mxu1 %v1551_v4 }
 0xe97   :  { %1020 = vmatpush1.bf16.msra.mxu1 %v1556_v5 }
 0xe98   :  { %1021 = vmatprep.subr.bf16.mxu1 %v1560_v6 }
 0xe9b   :  { %1022 = vmatpush1.bf16.msra.mxu1 %v1564_v7 }
 0xe9c   :  { %1023 = vmatprep.subr.bf16.mxu1 %v1568_v8 }
 0xe9f   :  { %1024 = vmatpush1.bf16.msra.mxu1 %v1572_v9 }
 0xea0   :  { %1025 = vmatprep.subr.bf16.mxu1 %v1576_v10 }
 0xea3   :  { %1026 = vmatpush1.bf16.msra.mxu1 %v1580_v11 }
 0xea4   :  { %1027 = vmatprep.subr.bf16.mxu1 %v1584_v12 }
 0xea7   :  { %1028 = vmatpush1.bf16.msra.mxu1 %v1588_v13 }
 0xf65   :  { %v807_v0 = vpop.f32.mrb[8].mxu1 }
 0xf66   :  { %v808_v3 = vadd.f32 %v807_v0, %v1617_v25  ;;  %v809_v4 = vpop.f32.mrb[9].mxu1 }
 0xf67   :  { %v810_v5 = vadd.f32 %v809_v4, %v1619_v26  ;;  %v811_v6 = vpop.f32.mrb[10].mxu1 }
 0xf68   :  { %1321 = vtanh.f32 %v808_v3  ;;  %v812_v7 = vpop.f32.mrb[11].mxu1  ;;  %v1169_v10 = vmul.f32 -1.442695, %v808_v3 }
 0xf69   :  { %1323 = vtanh.f32 %v810_v5  ;;  %v1170_v11 = vmul.f32 -1.442695, %v810_v5 }
 0xf6a   :  { %1325 = vpow2.f32 %v1169_v10 }
 0xf6b   :  { %1327 = vpow2.f32 %v1170_v11 }
 0xf72   :  { %v1322_v8 = vpop.eup %1321 }
 0xf73   :  { %v1324_v9 = vpop.eup %1323  ;;  %830 = vrot.lane.b32.xlu1 %v1322_v8, %s1471_s2 }
 0xf74   :  { %847 = vrot.lane.b32.xlu0 %v1324_v9, %s1471_s2  ;;  %v1326_v12 = vpop.eup %1325 }
 0xf75   :  { %v1328_v13 = vpop.eup %1327  ;;  %v820_v51 = vadd.f32 1.0, %v1326_v12 }
 0xf76   :  { %v821_v60 = vadd.f32 1.0, %v1328_v13 }
 0xf77   :  { %1329 = vrcp.f32 %v820_v51 }
 0xf78   :  { %1331 = vrcp.f32 %v821_v60 }
 0xf81   :  { %v1330_v62 = vpop.eup %1329 }
 0xf82   :  { %v1332_v15 = vpop.eup %1331  ;;  %v828_v27 = vmul.f32 %v1330_v62, %v1810_v33 }
 0xf83   :  { %v845_v30 = vmul.f32 %v1332_v15, %v1812_v35 }
 0xfe5   :  { %v831_v1 = vpop.permute.xlu1 %830 }
 0xfe6   :  { %v833_v20 = vmul.f32 %v1330_v62, %v831_v1  ;;  %v848_v22 = vpop.permute.xlu0 %847 }
 0xfe7   :  { %v850_v23 = vmul.f32 %v1332_v15, %v848_v22 }
 0xfe8   :  { %835 = vrot.lane.b32.xlu1 %v833_v20, %s1472_s22 }
 0xfe9   :  { %852 = vrot.lane.b32.xlu0 %v850_v23, %s1472_s22 }
0x105a   :  { %v836_v29 = vpop.permute.xlu1 %835 }
0x105b   :  { %v1852_v31 = vadd.f32 %v836_v29, %v828_v27  ;;  %v853_v32 = vpop.permute.xlu0 %852 }
0x105c   :  { %v1854_v34 = vadd.f32 %v853_v32, %v845_v30 }
0x105d   :  { %1333 = vtanh.f32 %v1852_v31 }
0x105e   :  { %1335 = vtanh.f32 %v1854_v34 }
0x1067   :  { %v1334_v37 = vpop.eup %1333 }
0x1068   :  { %v1336_v38 = vpop.eup %1335  ;;  %841 = vrot.lane.b32.xlu1 %v1334_v37, %s1471_s2 }
0x1069   :  { %858 = vrot.lane.b32.xlu0 %v1336_v38, %s1471_s2 }
0x10da   :  { %v842_v39 = vpop.permute.xlu1 %841 }
0x10db   :  { %v1860_v19 = vmul.f32 %v1330_v62, %v842_v39  ;;  %v859_v2 = vpop.permute.xlu0 %858 }
0x10dc   :  { %v861_v40 = vmul.f32 %v1332_v15, %v859_v2 }
0x10dd   :  { %v1213_v41 = vpack.i.bf16 %v1643_v61, %v1860_v19 }
0x10de   :  { %867 = vrot.lane.b32.xlu0 %v861_v40, %s1473_s23 }
0x10df   :  { %1214 = vrot.lane.b32.xlu1 %v1213_v41, %s1470_s21 }
0x1150   :  { %v1868_v56 = vpop.permute.xlu0 %867 }
0x1151   :  { %v1215_v42 = vpop.permute.xlu1 %1214 }
0x1152   :  { %v1217_v43 = vunpack.i.h.bf16 %v1215_v42  ;;  %v1216_v44 = vunpack.i.l.bf16 %v1215_v42 }
0x1154   :  { %v888_v49 = vsel %vm75_vm0, %v1635_v55, %v1216_v44 }
0x1155   :  { %v889_v58 = vsel %vm77_vm1, %v888_v49, %v1217_v43 }
0x1156   :  { %v890_v0 = vsel %vm79_vm2, %v889_v58, %v1868_v56 }
0x1157   :  { %v891_v3 = vpack.c.bf16 %v890_v0, %v890_v0 }
0x1159   :  { %1171 = vmatmul.mubr.msk.bf16.vlgmr.msra.gmra.mrb[12].mxu0 %vm153_vm3, %v891_v3  ;;  %v1369_v3 = vld [vmem:[#allocation2 + $0x38] sm:$0xff] }
0x122c   :  { %v929_v61 = vpop.f32.mrb[12].mxu0 }
0x122d   :  { %v930_v4 = vadd.f32 %v929_v61, %v1617_v25  ;;  %v931_v5 = vpop.f32.mrb[13].mxu0 }
0x122e   :  { %v932_v6 = vadd.f32 %v931_v5, %v1619_v26  ;;  %v933_v7 = vpop.f32.mrb[14].mxu0 }
0x122f   :  { %1337 = vtanh.f32 %v930_v4  ;;  %v934_v8 = vpop.f32.mrb[15].mxu0  ;;  %v1172_v10 = vmul.f32 -1.442695, %v930_v4 }
0x1230   :  { %1339 = vtanh.f32 %v932_v6  ;;  %v1173_v11 = vmul.f32 -1.442695, %v932_v6 }
0x1231   :  { %1341 = vpow2.f32 %v1172_v10 }
0x1232   :  { %1343 = vpow2.f32 %v1173_v11 }
0x1239   :  { %v1338_v55 = vpop.eup %1337 }
0x123a   :  { %v1340_v9 = vpop.eup %1339  ;;  %952 = vrot.lane.b32.xlu1 %v1338_v55, %s1471_s2 }
0x123b   :  { %969 = vrot.lane.b32.xlu0 %v1340_v9, %s1471_s2  ;;  %v1342_v12 = vpop.eup %1341 }
0x123c   :  { %v1344_v13 = vpop.eup %1343  ;;  %v942_v51 = vadd.f32 1.0, %v1342_v12 }
0x123d   :  { %v943_v60 = vadd.f32 1.0, %v1344_v13 }
0x123e   :  { %1345 = vrcp.f32 %v942_v51 }
0x123f   :  { %1347 = vrcp.f32 %v943_v60 }
0x1248   :  { %v1346_v62 = vpop.eup %1345 }
0x1249   :  { %v1348_v15 = vpop.eup %1347  ;;  %v950_v27 = vmul.f32 %v1346_v62, %v1852_v31 }
0x124a   :  { %v967_v30 = vmul.f32 %v1348_v15, %v1854_v34 }
0x12ac   :  { %v953_v1 = vpop.permute.xlu1 %952 }
0x12ad   :  { %v955_v20 = vmul.f32 %v1346_v62, %v953_v1  ;;  %v970_v22 = vpop.permute.xlu0 %969 }
0x12ae   :  { %v972_v23 = vmul.f32 %v1348_v15, %v970_v22 }
0x12af   :  { %957 = vrot.lane.b32.xlu1 %v955_v20, %s1472_s22 }
0x12b0   :  { %974 = vrot.lane.b32.xlu0 %v972_v23, %s1472_s22 }
0x1321   :  { %v958_v29 = vpop.permute.xlu1 %957 }
0x1322   :  { %v1882_v32 = vadd.f32 %v958_v29, %v950_v27  ;;  %v975_v37 = vpop.permute.xlu0 %974 }
0x1323   :  { %v1884_v38 = vadd.f32 %v975_v37, %v967_v30 }
0x1324   :  { %1349 = vtanh.f32 %v1882_v32 }
0x1325   :  { %1351 = vtanh.f32 %v1884_v38 }
0x132e   :  { %v1350_v39 = vpop.eup %1349 }
0x132f   :  { %v1352_v2 = vpop.eup %1351  ;;  %963 = vrot.lane.b32.xlu1 %v1350_v39, %s1471_s2 }
0x1330   :  { %980 = vrot.lane.b32.xlu0 %v1352_v2, %s1471_s2 }
0x13a1   :  { %v964_v40 = vpop.permute.xlu1 %963 }
0x13a2   :  { %v1890_v41 = vmul.f32 %v1346_v62, %v964_v40  ;;  %v981_v42 = vpop.permute.xlu0 %980 }
0x13a3   :  { %v983_v43 = vmul.f32 %v1348_v15, %v981_v42 }
0x13a4   :  { %v1218_v44 = vpack.i.bf16 %v1597_v14, %v1890_v41 }
0x13a5   :  { %989 = vrot.lane.b32.xlu0 %v983_v43, %s1473_s23 }
0x13a6   :  { %1219 = vrot.lane.b32.xlu1 %v1218_v44, %s1470_s21 }
0x1417   :  { %v1897_v4 = vpop.permute.xlu0 %989 }
0x1418   :  { %v1220_v49 = vpop.permute.xlu1 %1219 }
0x1419   :  { %v1222_v58 = vunpack.i.h.bf16 %v1220_v49  ;;  %v1221_v0 = vunpack.i.l.bf16 %v1220_v49 }
0x141b   :  { %v1010_v61 = vsel %vm75_vm0, %v1369_v3, %v1221_v0 }
0x141c   :  { %v1011_v5 = vsel %vm77_vm1, %v1010_v61, %v1222_v58 }
0x141d   :  { %v1012_v6 = vsel %vm79_vm2, %v1011_v5, %v1897_v4 }
0x141e   :  { %v1013_v7 = vpack.c.bf16 %v1012_v6, %v1012_v6 }
0x1420   :  { %1174 = vmatmul.mubr.msk.bf16.vlgmr.msra.gmra.mrb[12].mxu1 %vm153_vm3, %v1013_v7 }
0x14f3   :  { %v1051_v14 = vpop.f32.mrb[12].mxu1 }
0x14f4   :  { %v1052_v8 = vadd.f32 %v1051_v14, %v1617_v25  ;;  %v1053_v55 = vpop.f32.mrb[13].mxu1 }
0x14f5   :  { %v1054_v9 = vadd.f32 %v1053_v55, %v1619_v26  ;;  %v1055_v10 = vpop.f32.mrb[14].mxu1 }
0x14f6   :  { %1353 = vtanh.f32 %v1052_v8  ;;  %v1056_v11 = vpop.f32.mrb[15].mxu1  ;;  %v1175_v51 = vmul.f32 -1.442695, %v1052_v8 }
0x14f7   :  { %1355 = vtanh.f32 %v1054_v9  ;;  %v1176_v60 = vmul.f32 -1.442695, %v1054_v9 }
0x14f8   :  { %1357 = vpow2.f32 %v1175_v51 }
0x14f9   :  { %1359 = vpow2.f32 %v1176_v60 }
0x1500   :  { %v1354_v12 = vpop.eup %1353 }
0x1501   :  { %v1356_v13 = vpop.eup %1355  ;;  %1074 = vrot.lane.b32.xlu1 %v1354_v12, %s1471_s2 }
0x1502   :  { %1091 = vrot.lane.b32.xlu0 %v1356_v13, %s1471_s2  ;;  %v1358_v62 = vpop.eup %1357 }
0x1503   :  { %v1360_v1 = vpop.eup %1359  ;;  %v1064_v25 = vadd.f32 1.0, %v1358_v62 }
0x1504   :  { %v1065_v15 = vadd.f32 1.0, %v1360_v1 }
0x1505   :  { %1361 = vrcp.f32 %v1064_v25 }
0x1506   :  { %1363 = vrcp.f32 %v1065_v15 }
0x150f   :  { %v1362_v26 = vpop.eup %1361 }
0x1510   :  { %v1364_v22 = vpop.eup %1363  ;;  %v1072_v30 = vmul.f32 %v1362_v26, %v1882_v32 }
0x1511   :  { %v1089_v39 = vmul.f32 %v1364_v22, %v1884_v38 }
0x1573   :  { %v1075_v20 = vpop.permute.xlu1 %1074 }
0x1574   :  { %v1077_v23 = vmul.f32 %v1362_v26, %v1075_v20  ;;  %v1092_v27 = vpop.permute.xlu0 %1091 }
0x1575   :  { %v1094_v29 = vmul.f32 %v1364_v22, %v1092_v27 }
0x1576   :  { %1079 = vrot.lane.b32.xlu1 %v1077_v23, %s1472_s22 }
0x1577   :  { %1096 = vrot.lane.b32.xlu0 %v1094_v29, %s1472_s22 }
0x15e8   :  { %v1080_v37 = vpop.permute.xlu1 %1079 }
0x15e9   :  { %v1911_v2 = vadd.f32 %v1080_v37, %v1072_v30  ;;  %v1097_v40 = vpop.permute.xlu0 %1096 }
0x15ea   :  { %v1099_v42 = vadd.f32 %v1097_v40, %v1089_v39 }
0x15eb   :  { %1365 = vtanh.f32 %v1911_v2 }
0x15ec   :  { %1367 = vtanh.f32 %v1099_v42 }
0x15f5   :  { %v1366_v43 = vpop.eup %1365 }
0x15f6   :  { %v1368_v44 = vpop.eup %1367  ;;  %1085 = vrot.lane.b32.xlu1 %v1366_v43, %s1471_s2 }
0x15f7   :  { %1102 = vrot.lane.b32.xlu0 %v1368_v44, %s1471_s2 }
0x15fa   :  { %247 = vrot.lane.b32.xlu1 %v1637_v57, %s1472_s22 }
0x15fb   :  { %371 = vrot.lane.b32.xlu0 %v1684_v54, %s1472_s22 }
0x15fe   :  { %495 = vrot.lane.b32.xlu1 %v1731_v63, %s1472_s22 }
0x15ff   :  { %619 = vrot.lane.b32.xlu0 %v1776_v28, %s1472_s22 }
0x1602   :  { %741 = vrot.lane.b32.xlu1 %v1818_v59, %s1472_s22 }
0x1603   :  { %863 = vrot.lane.b32.xlu0 %v1860_v19, %s1472_s22 }
0x1606   :  { %985 = vrot.lane.b32.xlu1 %v1890_v41, %s1472_s22 }
0x1607   :  { %255 = vrot.lane.b32.xlu0 %v1629_v52, %s1471_s2 }
0x160a   :  { %379 = vrot.lane.b32.xlu1 %v1676_v47, %s1471_s2 }
0x160b   :  { %503 = vrot.lane.b32.xlu0 %v1723_v53, %s1471_s2 }
0x160e   :  { %627 = vrot.lane.b32.xlu1 %v1770_v21, %s1471_s2 }
0x160f   :  { %749 = vrot.lane.b32.xlu0 %v1812_v35, %s1471_s2 }
0x1612   :  { %871 = vrot.lane.b32.xlu1 %v1854_v34, %s1471_s2 }
0x1668   :  { %v1086_v57 = vpop.permute.xlu1 %1085 }
0x1669   :  { %v1088_v54 = vmul.f32 %v1362_v26, %v1086_v57  ;;  %v1103_v63 = vpop.permute.xlu0 %1102 }
0x166a   :  { %v1105_v28 = vmul.f32 %v1364_v22, %v1103_v63 }
0x166b   :  { %1107 = vrot.lane.b32.xlu0 %v1088_v54, %s1472_s22 }
0x166c   :  { %1111 = vrot.lane.b32.xlu1 %v1105_v28, %s1473_s23  ;;  %v248_v52 = vpop.permute.xlu1 %247 }
0x166d   :  { %v372_v47 = vpop.permute.xlu0 %371  ;;  %v259_v34 = vsel %vm258_vm4, %v248_v52, %v1627_v50 }
0x166e   :  { %v382_v41 = vsel %vm258_vm4, %v372_v47, %v1674_v45  ;;  %v260_v58 = vsel %vm79_vm2, %v259_v34, %v1647_v16 }
0x166f   :  { %993 = vrot.lane.b32.xlu0 %v1884_v38, %s1471_s2  ;;  %v383_v3 = vsel %vm79_vm2, %v382_v41, %v1694_v17 }
0x1670   :  { %1115 = vrot.lane.b32.xlu1 %v1099_v42, %s1471_s2  ;;  %v496_v53 = vpop.permute.xlu1 %495 }
0x1671   :  { %v620_v21 = vpop.permute.xlu0 %619  ;;  %v506_v38 = vsel %vm258_vm4, %v496_v53, %v1721_v48 }
0x1672   :  { %v630_v50 = vsel %vm258_vm4, %v620_v21, %v1768_v18  ;;  %v507_v6 = vsel %vm79_vm2, %v506_v38, %v1741_v24 }
0x1673   :  { %v631_v17 = vsel %vm79_vm2, %v630_v50, %v1784_v36 }
0x1674   :  { %v742_v35 = vpop.permute.xlu1 %741 }
0x1675   :  { %v864_v59 = vpop.permute.xlu0 %863  ;;  %v752_v16 = vsel %vm258_vm4, %v742_v35, %v1810_v33 }
0x1676   :  { %v874_v18 = vsel %vm258_vm4, %v864_v59, %v1852_v31  ;;  %v753_v24 = vsel %vm79_vm2, %v752_v16, %v1826_v46 }
0x1677   :  { %v875_v55 = vsel %vm79_vm2, %v874_v18, %v1868_v56 }
0x1678   :  { %v986_v19 = vpop.permute.xlu1 %985 }
0x1679   :  { %v256_v49 = vpop.permute.xlu0 %255  ;;  %v996_v31 = vsel %vm258_vm4, %v986_v19, %v1882_v32 }
0x167a   :  { %v261_v0 = vsel %vm153_vm3, %v260_v58, %v256_v49  ;;  %v997_v13 = vsel %vm79_vm2, %v996_v31, %v1897_v4 }
0x167b   :  { %262 = vst [vmem:[#allocation8] sm:$0xff] %v261_v0 }
0x167c   :  { %v380_v61 = vpop.permute.xlu1 %379 }
0x167d   :  { %v384_v5 = vsel %vm153_vm3, %v383_v3, %v380_v61  ;;  %v504_v45 = vpop.permute.xlu0 %503 }
0x167e   :  { %386 = vst [vmem:[#allocation8 + $0x8] sm:$0xff] %v384_v5  ;;  %v508_v48 = vsel %vm153_vm3, %v507_v6, %v504_v45 }
0x167f   :  { %510 = vst [vmem:[#allocation8 + $0x10] sm:$0xff] %v508_v48 }
0x1680   :  { %v628_v7 = vpop.permute.xlu1 %627 }
0x1681   :  { %v632_v14 = vsel %vm153_vm3, %v631_v17, %v628_v7  ;;  %v750_v8 = vpop.permute.xlu0 %749 }
0x1682   :  { %634 = vst [vmem:[#allocation8 + $0x18] sm:$0xff] %v632_v14  ;;  %v754_v33 = vsel %vm153_vm3, %v753_v24, %v750_v8 }
0x1683   :  { %756 = vst [vmem:[#allocation8 + $0x20] sm:$0xff] %v754_v33 }
0x1684   :  { %v872_v9 = vpop.permute.xlu1 %871 }
0x1685   :  { %v876_v36 = vsel %vm153_vm3, %v875_v55, %v872_v9 }
0x1686   :  { %878 = vst [vmem:[#allocation8 + $0x28] sm:$0xff] %v876_v36 }
0x16dd   :  { %v1108_v10 = vpop.permute.xlu0 %1107 }
0x16de   :  { %v1112_v11 = vpop.permute.xlu1 %1111  ;;  %v1118_v12 = vsel %vm258_vm4, %v1108_v10, %v1911_v2 }
0x16df   :  { %v1119_v56 = vsel %vm79_vm2, %v1118_v12, %v1112_v11 }
0x16e1   :  { %v994_v46 = vpop.permute.xlu0 %993 }
0x16e2   :  { %v998_v51 = vsel %vm153_vm3, %v997_v13, %v994_v46  ;;  %v1116_v60 = vpop.permute.xlu1 %1115 }
0x16e3   :  { %1000 = vst [vmem:[#allocation8 + $0x30] sm:$0xff] %v998_v51  ;;  %v1120_v62 = vsel %vm153_vm3, %v1119_v56, %v1116_v60 }
0x16e4   :  { %1122 = vst [vmem:[#allocation8 + $0x38] sm:$0xff] %v1120_v62 }
0x16e5   :  { %1447 = shalt.err (!%p1444_p0)
}
0x16e6   :  { %s1448_s4 = scalar_lea.hbm %s2004_s3, 1024 }
0x16e7   :  { %p1449_p1 = scmp.ne.s32.totalorder %s2004_s3, %s1448_s4  ;;  %p1452_p2 = scmp.lt.u32.totalorder %s1448_s4, %s2004_s3 }
0x16e9   :  { %p1454_p3 = pnand %p1452_p2, %p1449_p1 }
0x16eb   :  { %1457 = shalt.err (!%p1454_p3)
}
0x16ec   :  { %1134 = dma.vmem_to_hbm [thread:$0]  %s1129_s27, 1024, %s2004_s3, [#allocation4], %s1466_s24, %s1466_s24, %s1467_s25  }
0x16ed   :  { %1462 = dma.done.wait [#allocation4], 1024  }
0x16ee   :  { %1463 = vsyncadd [#allocation4], 4294966272 }
0x16ef   :  { %1138 = vsyncpa [#allocation3], 1 }
0x16f0   :  { %1139 = vsyncpa [#allocation6], 1 }
0x16f1   :  { %1140 = vsyncpa [#allocation4], 1 }

</bundles_post_ra>
